<compile_context>
chip_gen: v7x
topology: tpu7x:2x2x1
jax: 0.10.0
libtpu: 0.0.40
codegen_flags: <defaults>
</compile_context>

<pallas_src>
import jax
import jax.numpy as jnp
from jax.experimental import pallas as pl
from jax.experimental.pallas import tpu as pltpu

IN_DIM = 784
OUT_DIM = 784


def fe_mlp_kernel(x_ref, w_ref, b_ref, out_ref):
    # MXU matmul with bf16 operands, f32 accumulation.
    x = x_ref[...].astype(jnp.bfloat16)          # (TM, 784) bf16
    y = jnp.dot(x, w_ref[...], preferred_element_type=jnp.float32)  # (TM, 784) f32
    y = y + b_ref[...]                           # bias add in f32
    out_ref[...] = jnp.maximum(y, 0.0).astype(out_ref.dtype)


def fe_mlp_forward(x, w_t_bf16, b, *, tm=256):
    """x: any shape flattening to (-1, 784). w_t_bf16: (784, 784) bf16 (pre-transposed,
    i.e. y = x @ W_t). b: (1, 784) f32. Returns relu(x @ W_t + b) as f32."""
    x = x.reshape(-1, IN_DIM).astype(jnp.float32)
    B = x.shape[0]

    # Pick a batch tile: full MXU row tile for big B, otherwise a small multiple of 8.
    if B >= tm:
        TM = tm
    else:
        TM = max(8, ((B + 7) // 8) * 8)

    # Pad batch so the grid divides evenly (padded rows are sliced off afterwards).
    Bp = ((B + TM - 1) // TM) * TM
    if Bp != B:
        x = jnp.pad(x, ((0, Bp - B), (0, 0)))

    grid = (Bp // TM,)

    out = pl.pallas_call(
        fe_mlp_kernel,
        out_shape=jax.ShapeDtypeStruct((Bp, OUT_DIM), jnp.float32),
        grid_spec=pltpu.PrefetchScalarGridSpec(
            num_scalar_prefetch=0,
            grid=grid,
            in_specs=[
                # Batch tile of activations: pipelined / double-buffered across grid steps.
                pl.BlockSpec((TM, IN_DIM), lambda i: (i, 0)),
                # Weight & bias: constant index_map -> fetched once, resident in VMEM.
                pl.BlockSpec((IN_DIM, OUT_DIM), lambda i: (0, 0)),
                pl.BlockSpec((1, OUT_DIM), lambda i: (0, 0)),
            ],
            out_specs=pl.BlockSpec((TM, OUT_DIM), lambda i: (i, 0)),
        ),
        compiler_params=pltpu.CompilerParams(
            dimension_semantics=("parallel",),   # megacore sharding on v7x
            vmem_limit_bytes=16 << 20,           # actual use is a few MB
        ),
    )(x, w_t_bf16, b)

    return out[:B]


def init_params(key):
    """PyTorch Linear default init: U(-1/sqrt(in), 1/sqrt(in)). Weight stored
    pre-transposed (in, out); the matmul copy is kept in bf16."""
    kw, kb = jax.random.split(key)
    bound = 1.0 / jnp.sqrt(jnp.float32(IN_DIM))
    w_t = jax.random.uniform(kw, (IN_DIM, OUT_DIM), jnp.float32, -bound, bound)
    b = jax.random.uniform(kb, (1, OUT_DIM), jnp.float32, -bound, bound)
    return w_t.astype(jnp.bfloat16), b


def reference_forward(x, w_t_bf16, b):
    """Reference with the same bf16-operand / f32-accumulate contraction."""
    x = x.reshape(-1, IN_DIM).astype(jnp.float32)
    y = jnp.dot(x.astype(jnp.bfloat16), w_t_bf16, preferred_element_type=jnp.float32)
    return jnp.maximum(y + b, 0.0)


if __name__ == "__main__":
    key = jax.random.PRNGKey(0)
    key, kx = jax.random.split(key)

    B = 8
    # inputs conceptually (B, 1, 28, 28) images; forward flattens to (B, 784)
    x_img = jax.random.normal(kx, (B, 1, 28, 28), jnp.float32)

    w_t_bf16, b = init_params(key)

    out = fe_mlp_forward(x_img, w_t_bf16, b)
    out = jax.block_until_ready(out)

    ref = reference_forward(x_img, w_t_bf16, b)
    assert out.shape == (B, OUT_DIM)
    assert bool(jnp.all(out >= 0.0))                      # ReLU output
    assert jnp.allclose(out, ref, atol=2e-2, rtol=2e-2)   # bf16 matmul tolerance

    print("KERNEL_OK")
</pallas_src>

<mosaic_0001>
module attributes {stable_mosaic.version = 11 : i64} {
  func.func @fe_mlp_kernel(%arg0: i32, %arg1: memref<8x784xf32, #tpu.memory_space<vmem>>, %arg2: memref<784x784xbf16, #tpu.memory_space<vmem>>, %arg3: memref<1x784xf32, #tpu.memory_space<vmem>>, %arg4: memref<8x784xf32, #tpu.memory_space<vmem>>) attributes {dimension_semantics = [#tpu.dimension_semantics<parallel>], iteration_bounds = array<i64: 1>, scalar_prefetch = 0 : i64, scratch_operands = 0 : i64, tpu.core_type = #tpu.core_type<tc>, window_params = [{transform_indices = @transform_0, window_bounds = array<i64: 8, 784>}, {pipeline_mode = #tpu.pipeline_mode<synchronous>, transform_indices = @transform_1, window_bounds = array<i64: 784, 784>}, {pipeline_mode = #tpu.pipeline_mode<synchronous>, transform_indices = @transform_2, window_bounds = array<i64: 1, 784>}, {transform_indices = @transform_3, window_bounds = array<i64: 8, 784>}]} {
    %c0 = arith.constant 0 : index
    %c0_0 = arith.constant 0 : index
    %0 = vector.load %arg1[%c0, %c0_0] : memref<8x784xf32, #tpu.memory_space<vmem>>, vector<8x784xf32>
    %1 = arith.truncf %0 : vector<8x784xf32> to vector<8x784xbf16>
    %c0_1 = arith.constant 0 : index
    %c0_2 = arith.constant 0 : index
    %2 = vector.load %arg2[%c0_1, %c0_2] : memref<784x784xbf16, #tpu.memory_space<vmem>>, vector<784x784xbf16>
    %cst = arith.constant dense<0.000000e+00> : vector<8x784xf32>
    %3 = tpu.matmul %1, %2, %cst {dimension_numbers = #tpu.dot_dimension_numbers<[1], [0], [0], [1], [0, 0, 1, 1], [], []>} : vector<8x784xbf16>, vector<784x784xbf16>, vector<8x784xf32> -> vector<8x784xf32>
    %c0_3 = arith.constant 0 : index
    %c0_4 = arith.constant 0 : index
    %4 = vector.load %arg3[%c0_3, %c0_4] : memref<1x784xf32, #tpu.memory_space<vmem>>, vector<1x784xf32>
    %5 = vector.broadcast %4 : vector<1x784xf32> to vector<8x784xf32>
    %6 = arith.addf %3, %5 : vector<8x784xf32>
    %cst_5 = arith.constant 0.000000e+00 : f32
    %7 = vector.broadcast %cst_5 : f32 to vector<8x784xf32>
    %8 = arith.maximumf %6, %7 : vector<8x784xf32>
    %c0_6 = arith.constant 0 : index
    %c0_7 = arith.constant 0 : index
    %9 = vector.load %arg4[%c0_6, %c0_7] : memref<8x784xf32, #tpu.memory_space<vmem>>, vector<8x784xf32>
    tpu.vector_store %arg4[%c0_6, %c0_7], %8 {strides = array<i32>} : memref<8x784xf32, #tpu.memory_space<vmem>>, vector<8x784xf32>,
    return
  }
  func.func @transform_0(%arg0: i32) -> (i32, i32) {
    %c0_i32 = arith.constant 0 : i32
    %c0_i32_0 = arith.constant 0 : i32
    return %arg0, %c0_i32 : i32, i32
  }
  func.func @transform_1(%arg0: i32) -> (i32, i32) {
    %c0_i32 = arith.constant 0 : i32
    %c0_i32_0 = arith.constant 0 : i32
    %c0_i32_1 = arith.constant 0 : i32
    return %c0_i32, %c0_i32_0 : i32, i32
  }
  func.func @transform_2(%arg0: i32) -> (i32, i32) {
    %c0_i32 = arith.constant 0 : i32
    %c0_i32_0 = arith.constant 0 : i32
    %c0_i32_1 = arith.constant 0 : i32
    return %c0_i32, %c0_i32_0 : i32, i32
  }
  func.func @transform_3(%arg0: i32) -> (i32, i32) {
    %c0_i32 = arith.constant 0 : i32
    %c0_i32_0 = arith.constant 0 : i32
    return %arg0, %c0_i32 : i32, i32
  }
}

</mosaic_0001>

<bundles_post_ra>
// kernel: tpu_custom_call.1
= control target key start
LH: loop header
LB: loop body
LE: loop exit
PB: predicated region body
PF: predicated region fallthrough
CT: control target
= control target key end

     0   :  { %8 = vsyncpa [#allocation3], 0  ;;  %s4149_s0 = inlined_call_operand.hbm [shape: f32[8,784], index: 0, kind: input, shape index: {}]   ;;  %s4150_s1 = inlined_call_operand.hbm [shape: bf16[784,784], index: 1, kind: input, shape index: {}]   ;;  %s4151_s2 = inlined_call_operand.hbm [shape: f32[1,784], index: 2, kind: input, shape index: {}]   ;;  %s4152_s3 = inlined_call_operand.hbm [shape: f32[8,784], index: 3, kind: output, shape index: {}]  }
   0x1   :  { %9 = vsyncpa [#allocation6], 0 }
   0x2   :  { %10 = vsyncpa [#allocation4], 0  ;;  %s3998_s12 = smov [#allocation5]   ;;  %s3904_s16 = scalar_lea.hbm %s4150_s1, 43904 }
   0x3   :  { %s26_s13 = sshll.u32 %s3998_s12, 4  ;;  %p3905_p0 = scmp.ne.s32.totalorder %s4150_s1, %s3904_s16  ;;  %s27_s13 = int_to_ptr.vmem [resolvable:$true] %s26_s13 }
   0x4   :  { %p3908_p1 = scmp.lt.u32.totalorder %s3904_s16, %s4150_s1 }
   0x6   :  { %p3910_p2 = pnand %p3908_p1, %p3905_p0 }
   0x8   :  { %3913 = shalt.err (!%p3910_p2)
}
   0x9   :  { %s3914_s21 = scalar_lea.vmem %s27_s13, 43904  ;;  %p3919_p4 = scmp.lt.s32.totalorder %s27_s13, %s27_s13 }
   0xa   :  { %p3915_p3 = scmp.ne.s32.totalorder %s27_s13, %s3914_s21  ;;  %p3920_p5 = scmp.lt.s32.totalorder %s3914_s21, %s3914_s21 }
   0xc   :  { %p3921_p6 = por %p3920_p5, %p3919_p4 }
   0xe   :  { %p3922_p7 = pnand %p3921_p6, %p3915_p3 }
  0x10   :  { %3925 = shalt.err (!%p3922_p7)
}
  0x11   :  { %s3999_s22 = smov 448   ;;  %s4000_s23 = smov 28  }
  0x12   :  { %32 = dma.hbm_to_vmem [thread:$0]  %s4150_s1, 43904, %s27_s13, [#allocation6], %s3999_s22, %s3999_s22, %s4000_s23  }
  0x13   :  { %s4001_s26 = smov [#allocation2]   ;;  %s4002_s28 = smov [#allocation7]  }
  0x14   :  { %s17_s27 = sshll.u32 %s4001_s26, 4  ;;  %s39_s29 = sshll.u32 %s4002_s28, 4  ;;  %s18_s27 = int_to_ptr.vmem [resolvable:$true] %s17_s27  ;;  %s40_s29 = int_to_ptr.vmem [resolvable:$true] %s39_s29 }
  0x15   :  { %s3926_s5 = scalar_lea.hbm %s4149_s0, 896 }
  0x16   :  { %p3927_p8 = scmp.ne.s32.totalorder %s4149_s0, %s3926_s5  ;;  %p3930_p9 = scmp.lt.u32.totalorder %s3926_s5, %s4149_s0 }
  0x18   :  { %p3932_p10 = pnand %p3930_p9, %p3927_p8 }
  0x1a   :  { %3935 = shalt.err (!%p3932_p10)
}
  0x1b   :  { %s3936_s1 = scalar_lea.vmem %s18_s27, 896  ;;  %p3941_p12 = scmp.lt.s32.totalorder %s18_s27, %s18_s27 }
  0x1c   :  { %p3937_p11 = scmp.ne.s32.totalorder %s18_s27, %s3936_s1  ;;  %p3942_p13 = scmp.lt.s32.totalorder %s3936_s1, %s3936_s1 }
  0x1e   :  { %p3943_p0 = por %p3942_p13, %p3941_p12 }
  0x20   :  { %p3944_p1 = pnand %p3943_p0, %p3937_p11 }
  0x22   :  { %3947 = shalt.err (!%p3944_p1)
}
  0x23   :  { %20 = dma.hbm_to_vmem [thread:$0]  %s4149_s0, 896, %s18_s27, [#allocation3]  }
  0x24   :  { %s3948_s14 = scalar_lea.hbm %s4151_s2, 112 }
  0x25   :  { %p3949_p2 = scmp.ne.s32.totalorder %s4151_s2, %s3948_s14  ;;  %p3952_p3 = scmp.lt.u32.totalorder %s3948_s14, %s4151_s2 }
  0x27   :  { %p3954_p4 = pnand %p3952_p3, %p3949_p2 }
  0x29   :  { %3957 = shalt.err (!%p3954_p4)
}
  0x2a   :  { %s3958_s19 = scalar_lea.vmem %s40_s29, 112  ;;  %s3962_s20 = scalar_lea.vmem %s40_s29, 128 }
  0x2b   :  { %p3959_p5 = scmp.ne.s32.totalorder %s40_s29, %s3958_s19  ;;  %p3963_p6 = scmp.lt.s32.totalorder %s40_s29, %s40_s29 }
  0x2c   :  { %p3964_p7 = scmp.lt.s32.totalorder %s3962_s20, %s3958_s19 }
  0x2e   :  { %p3965_p8 = por %p3964_p7, %p3963_p6 }
  0x30   :  { %p3966_p9 = pnand %p3965_p8, %p3959_p5 }
  0x32   :  { %3969 = shalt.err (!%p3966_p9)
}
  0x33   :  { %42 = dma.hbm_to_vmem [thread:$0]  %s4151_s2, 112, %s40_s29, [#allocation6]  }
  0x34   :  { %3992 = dma.done.wait [#allocation3], 896  }
  0x35   :  { %3993 = vsyncadd [#allocation3], 4294966400 }
  0x36   :  { %3994 = dma.done.wait [#allocation6], 44016  }
  0x37   :  { %3995 = vsyncadd [#allocation6], 4294923280  ;;  %v3414_v0 = vld [vmem:[#allocation5 + $0x4] ss:$28 sps:$4 sm:$0xff]   ;;  %v3420_v4 = vld [vmem:[#allocation5 + $0x3c] ss:$28 sps:$4 sm:$0xff]  }
  0x38   :  { %v3416_v1 = vld [vmem:[#allocation5 + $0x384] ss:$28 sps:$4 sm:$0xff]   ;;  %2264 = vmatprep.subr.bf16.mxu1 %v3414_v0  ;;  %v3422_v5 = vld [vmem:[#allocation5 + $0x3bc] ss:$28 sps:$4 sm:$0xff]   ;;  %v3426_v8 = vld [vmem:[#allocation5 + $0x74] ss:$28 sps:$4 sm:$0xff]  }
  0x39   :  { %v3418_v2 = vld [vmem:[#allocation5] ss:$28 sps:$4 sm:$0xff]   ;;  %2305 = vmatprep.subr.bf16.mxu0 %v3416_v1  ;;  %v3424_v6 = vld [vmem:[#allocation5 + $0x38] ss:$28 sps:$4 sm:$0xff]   ;;  %v3430_v10 = vld [vmem:[#allocation5 + $0x70] ss:$28 sps:$4 sm:$0xff]  }
  0x3a   :  { %v3419_v3 = vld [vmem:[#allocation5 + $0x380] ss:$28 sps:$4 sm:$0xff]   ;;  %2265 = vmatpush1.bf16.msra.mxu1 %v3418_v2  ;;  %v3425_v7 = vld [vmem:[#allocation5 + $0x3b8] ss:$28 sps:$4 sm:$0xff]   ;;  %v3431_v11 = vld [vmem:[#allocation5 + $0x3f0] ss:$28 sps:$4 sm:$0xff]  }
  0x3b   :  { %2306 = vmatpush1.bf16.msra.mxu0 %v3419_v3  ;;  %2266 = vmatprep.subr.bf16.mxu1 %v3420_v4  ;;  %v3428_v9 = vld [vmem:[#allocation5 + $0x3f4] ss:$28 sps:$4 sm:$0xff]   ;;  %v3432_v12 = vld [vmem:[#allocation5 + $0xac] ss:$28 sps:$4 sm:$0xff]   ;;  %v3438_v16 = vld [vmem:[#allocation5 + $0xe4] ss:$28 sps:$4 sm:$0xff]  }
  0x3c   :  { %2307 = vmatprep.subr.bf16.mxu0 %v3422_v5  ;;  %v3434_v13 = vld [vmem:[#allocation5 + $0x42c] ss:$28 sps:$4 sm:$0xff]   ;;  %v3440_v17 = vld [vmem:[#allocation5 + $0x464] ss:$28 sps:$4 sm:$0xff]   ;;  %v3444_v20 = vld [vmem:[#allocation5 + $0x11c] ss:$28 sps:$4 sm:$0xff]  }
  0x3d   :  { %v3436_v14 = vld [vmem:[#allocation5 + $0xa8] ss:$28 sps:$4 sm:$0xff]   ;;  %v3442_v18 = vld [vmem:[#allocation5 + $0xe0] ss:$28 sps:$4 sm:$0xff]   ;;  %v3448_v22 = vld [vmem:[#allocation5 + $0x118] ss:$28 sps:$4 sm:$0xff]  }
  0x3e   :  { %2267 = vmatpush1.bf16.msra.mxu1 %v3424_v6  ;;  %v3437_v15 = vld [vmem:[#allocation5 + $0x428] ss:$28 sps:$4 sm:$0xff]   ;;  %v3443_v19 = vld [vmem:[#allocation5 + $0x460] ss:$28 sps:$4 sm:$0xff]   ;;  %v3449_v23 = vld [vmem:[#allocation5 + $0x498] ss:$28 sps:$4 sm:$0xff]  }
  0x3f   :  { %2308 = vmatpush1.bf16.msra.mxu0 %v3425_v7  ;;  %2268 = vmatprep.subr.bf16.mxu1 %v3426_v8  ;;  %v3446_v21 = vld [vmem:[#allocation5 + $0x49c] ss:$28 sps:$4 sm:$0xff]   ;;  %v3450_v24 = vld [vmem:[#allocation5 + $0x154] ss:$28 sps:$4 sm:$0xff]   ;;  %v3456_v28 = vld [vmem:[#allocation5 + $0x18c] ss:$28 sps:$4 sm:$0xff]  }
  0x40   :  { %2309 = vmatprep.subr.bf16.mxu0 %v3428_v9  ;;  %v3452_v25 = vld [vmem:[#allocation5 + $0x4d4] ss:$28 sps:$4 sm:$0xff]   ;;  %v3458_v29 = vld [vmem:[#allocation5 + $0x50c] ss:$28 sps:$4 sm:$0xff]   ;;  %v3462_v32 = vld [vmem:[#allocation5 + $0x1c4] ss:$28 sps:$4 sm:$0xff]  }
  0x41   :  { %v3454_v26 = vld [vmem:[#allocation5 + $0x150] ss:$28 sps:$4 sm:$0xff]   ;;  %v3460_v30 = vld [vmem:[#allocation5 + $0x188] ss:$28 sps:$4 sm:$0xff]   ;;  %v3466_v34 = vld [vmem:[#allocation5 + $0x1c0] ss:$28 sps:$4 sm:$0xff]  }
  0x42   :  { %2269 = vmatpush1.bf16.msra.mxu1 %v3430_v10  ;;  %v3455_v27 = vld [vmem:[#allocation5 + $0x4d0] ss:$28 sps:$4 sm:$0xff]   ;;  %v3461_v31 = vld [vmem:[#allocation5 + $0x508] ss:$28 sps:$4 sm:$0xff]   ;;  %v3467_v35 = vld [vmem:[#allocation5 + $0x540] ss:$28 sps:$4 sm:$0xff]  }
  0x43   :  { %2310 = vmatpush1.bf16.msra.mxu0 %v3431_v11  ;;  %2270 = vmatprep.subr.bf16.mxu1 %v3432_v12  ;;  %v3464_v33 = vld [vmem:[#allocation5 + $0x544] ss:$28 sps:$4 sm:$0xff]   ;;  %v3468_v36 = vld [vmem:[#allocation5 + $0x1fc] ss:$28 sps:$4 sm:$0xff]   ;;  %v3474_v40 = vld [vmem:[#allocation5 + $0x234] ss:$28 sps:$4 sm:$0xff]  }
  0x44   :  { %2311 = vmatprep.subr.bf16.mxu0 %v3434_v13  ;;  %v3470_v37 = vld [vmem:[#allocation5 + $0x57c] ss:$28 sps:$4 sm:$0xff]   ;;  %v3476_v41 = vld [vmem:[#allocation5 + $0x5b4] ss:$28 sps:$4 sm:$0xff]   ;;  %v3480_v44 = vld [vmem:[#allocation5 + $0x26c] ss:$28 sps:$4 sm:$0xff]  }
  0x45   :  { %v3472_v38 = vld [vmem:[#allocation5 + $0x1f8] ss:$28 sps:$4 sm:$0xff]   ;;  %v3478_v42 = vld [vmem:[#allocation5 + $0x230] ss:$28 sps:$4 sm:$0xff]   ;;  %v56_v48 = vld [vmem:[#allocation2 + $0x18] sm:$0xff]  ;;  %vm2260_vm0 = vcmask 130048  }
  0x46   :  { %2271 = vmatpush1.bf16.msra.mxu1 %v3436_v14  ;;  %v3473_v39 = vld [vmem:[#allocation5 + $0x578] ss:$28 sps:$4 sm:$0xff]   ;;  %v3479_v43 = vld [vmem:[#allocation5 + $0x5b0] ss:$28 sps:$4 sm:$0xff]   ;;  %v3484_v49 = vld [vmem:[#allocation5 + $0x268] ss:$28 sps:$4 sm:$0xff]   ;;  %v4065_v51 = vpack.c.bf16 %v56_v48, %v56_v48 }
  0x47   :  { %2312 = vmatpush1.bf16.msra.mxu0 %v3437_v15  ;;  %2272 = vmatprep.subr.bf16.mxu1 %v3438_v16  ;;  %v3482_v45 = vld [vmem:[#allocation5 + $0x5ec] ss:$28 sps:$4 sm:$0xff]   ;;  %v54_v46 = vld [vmem:[#allocation2 + $0x8] sm:$0xff]  ;;  %v3486_v52 = vld [vmem:[#allocation5 + $0x2a4] ss:$28 sps:$4 sm:$0xff]   ;;  %vm4005_vm1 = vmmov 0  }
  0x48   :  { %2313 = vmatprep.subr.bf16.mxu0 %v3440_v17  ;;  %v4063_v47 = vpack.c.bf16 %v54_v46, %v54_v46  ;;  %v3485_v50 = vld [vmem:[#allocation5 + $0x5e8] ss:$28 sps:$4 sm:$0xff]   ;;  %2337 = vmatprep.mubr.bf16.mxu0 %v4065_v51  ;;  %v3490_v54 = vld [vmem:[#allocation5 + $0x2a0] ss:$28 sps:$4 sm:$0xff]   ;;  %v3496_v58 = vld [vmem:[#allocation5 + $0x2d8] ss:$28 sps:$4 sm:$0xff]  }
  0x49   :  { %v3488_v53 = vld [vmem:[#allocation5 + $0x624] ss:$28 sps:$4 sm:$0xff]   ;;  %v3492_v56 = vld [vmem:[#allocation5 + $0x2dc] ss:$28 sps:$4 sm:$0xff]   ;;  %v3498_v60 = vld [vmem:[#allocation5 + $0x314] ss:$28 sps:$4 sm:$0xff]  }
  0x4a   :  { %2273 = vmatpush1.bf16.msra.mxu1 %v3442_v18  ;;  %2296 = vmatprep.mubr.bf16.mxu1 %v4063_v47  ;;  %v3491_v55 = vld [vmem:[#allocation5 + $0x620] ss:$28 sps:$4 sm:$0xff]   ;;  %v3497_v59 = vld [vmem:[#allocation5 + $0x658] ss:$28 sps:$4 sm:$0xff]   ;;  %v3502_v62 = vld [vmem:[#allocation5 + $0x310] ss:$28 sps:$4 sm:$0xff]  }
  0x4b   :  { %2314 = vmatpush1.bf16.msra.mxu0 %v3443_v19  ;;  %2274 = vmatprep.subr.bf16.mxu1 %v3444_v20  ;;  %v3494_v57 = vld [vmem:[#allocation5 + $0x65c] ss:$28 sps:$4 sm:$0xff]   ;;  %v3500_v61 = vld [vmem:[#allocation5 + $0x694] ss:$28 sps:$4 sm:$0xff]   ;;  %v3504_v0 = vld [vmem:[#allocation5 + $0x34c] ss:$28 sps:$4 sm:$0xff]  }
  0x4c   :  { %2315 = vmatprep.subr.bf16.mxu0 %v3446_v21  ;;  %v3503_v63 = vld [vmem:[#allocation5 + $0x690] ss:$28 sps:$4 sm:$0xff]   ;;  %v3508_v2 = vld [vmem:[#allocation5 + $0x348] ss:$28 sps:$4 sm:$0xff]   ;;  %v55_v6 = vld [vmem:[#allocation2 + $0x10] sm:$0xff]  ;;  %s4006_s2 = smov [#allocation8]  }
  0x4d   :  { %v3506_v1 = vld [vmem:[#allocation5 + $0x6cc] ss:$28 sps:$4 sm:$0xff]   ;;  %v3512_v4 = vld [vmem:[#allocation5 + $0x704] ss:$28 sps:$4 sm:$0xff]   ;;  %v4071_v11 = vpack.c.bf16 %v55_v6, %v55_v6  ;;  %v3518_v12 = vld [vmem:[#allocation5 + $0x73c] ss:$28 sps:$4 sm:$0xff]  }
  0x4e   :  { %2275 = vmatpush1.bf16.msra.mxu1 %v3448_v22  ;;  %v3509_v3 = vld [vmem:[#allocation5 + $0x6c8] ss:$28 sps:$4 sm:$0xff]   ;;  %v3510_v8 = vld [vmem:[#allocation5 + $0x700] ss:$28 sps:$4 sm:$0xff]   ;;  %v3516_v14 = vld [vmem:[#allocation5 + $0x738] ss:$28 sps:$4 sm:$0xff]  }
  0x4f   :  { %2316 = vmatpush1.bf16.msra.mxu0 %v3449_v23  ;;  %2276 = vmatprep.subr.bf16.mxu1 %v3450_v24  ;;  %v53_v5 = vld [vmem:[#allocation2] sm:$0xff]  ;;  %v3521_v13 = vld [vmem:[#allocation5 + $0x44] ss:$28 sps:$4 sm:$0xff]   ;;  %v3524_v16 = vld [vmem:[#allocation5 + $0x774] ss:$28 sps:$4 sm:$0xff]   ;;  %s2936_s22 = sshll.u32 %s4006_s2, 4  ;;  %s2937_s22 = int_to_ptr.vmem [resolvable:$true] %s2936_s22 }
  0x50   :  { %2317 = vmatprep.subr.bf16.mxu0 %v3452_v25  ;;  %v3515_v7 = vld [vmem:[#allocation5 + $0xc] ss:$28 sps:$4 sm:$0xff]   ;;  %v4069_v10 = vpack.c.bf16 %v53_v5, %v53_v5  ;;  %v3519_v15 = vld [vmem:[#allocation5 + $0x40] ss:$28 sps:$4 sm:$0xff]   ;;  %v3525_v19 = vld [vmem:[#allocation5 + $0x78] ss:$28 sps:$4 sm:$0xff]   ;;  %p3975_p11 = scmp.lt.s32.totalorder %s2937_s22, %s2937_s22 }
  0x51   :  { %v3513_v9 = vld [vmem:[#allocation5 + $0x8] ss:$28 sps:$4 sm:$0xff]   ;;  %v3527_v17 = vld [vmem:[#allocation5 + $0x7c] ss:$28 sps:$4 sm:$0xff]   ;;  %v3522_v18 = vld [vmem:[#allocation5 + $0x770] ss:$28 sps:$4 sm:$0xff]  }
  0x52   :  { %2277 = vmatpush1.bf16.msra.mxu1 %v3454_v26  ;;  %v3530_v20 = vld [vmem:[#allocation5 + $0x7ac] ss:$28 sps:$4 sm:$0xff]   ;;  %v3533_v21 = vld [vmem:[#allocation5 + $0xb4] ss:$28 sps:$4 sm:$0xff]   ;;  %v3536_v24 = vld [vmem:[#allocation5 + $0x7e4] ss:$28 sps:$4 sm:$0xff]  }
  0x53   :  { %2318 = vmatpush1.bf16.msra.mxu0 %v3455_v27  ;;  %2278 = vmatprep.subr.bf16.mxu1 %v3456_v28  ;;  %v3528_v22 = vld [vmem:[#allocation5 + $0x7a8] ss:$28 sps:$4 sm:$0xff]   ;;  %v3531_v23 = vld [vmem:[#allocation5 + $0xb0] ss:$28 sps:$4 sm:$0xff]   ;;  %v3534_v26 = vld [vmem:[#allocation5 + $0x7e0] ss:$28 sps:$4 sm:$0xff]  }
  0x54   :  { %2319 = vmatprep.subr.bf16.mxu0 %v3458_v29  ;;  %v3539_v25 = vld [vmem:[#allocation5 + $0xec] ss:$28 sps:$4 sm:$0xff]   ;;  %v3542_v28 = vld [vmem:[#allocation5 + $0x81c] ss:$28 sps:$4 sm:$0xff]   ;;  %v3545_v29 = vld [vmem:[#allocation5 + $0x124] ss:$28 sps:$4 sm:$0xff]  }
  0x55   :  { %v3537_v27 = vld [vmem:[#allocation5 + $0xe8] ss:$28 sps:$4 sm:$0xff]   ;;  %v3566_v46 = vld [vmem:[#allocation5 + $0x8fc] ss:$28 sps:$4 sm:$0xff]   ;;  %v3594_v6 = vld [vmem:[#allocation5 + $0xa10] ss:$28 sps:$4 sm:$0xff]  }
  0x56   :  { %2279 = vmatpush1.bf16.msra.mxu1 %v3460_v30  ;;  %v3540_v30 = vld [vmem:[#allocation5 + $0x818] ss:$28 sps:$4 sm:$0xff]   ;;  %v3569_v48 = vld [vmem:[#allocation5 + $0x204] ss:$28 sps:$4 sm:$0xff]   ;;  %s3970_s23 = scalar_lea.vmem %s2937_s22, 896 }
  0x57   :  { %2320 = vmatpush1.bf16.msra.mxu0 %v3461_v31  ;;  %2280 = vmatprep.subr.bf16.mxu1 %v3462_v32  ;;  %v3543_v31 = vld [vmem:[#allocation5 + $0x120] ss:$28 sps:$4 sm:$0xff]   ;;  %v3548_v32 = vld [vmem:[#allocation5 + $0x854] ss:$28 sps:$4 sm:$0xff]   ;;  %p3971_p10 = scmp.ne.s32.totalorder %s2937_s22, %s3970_s23  ;;  %p3976_p12 = scmp.lt.s32.totalorder %s3970_s23, %s3970_s23 }
  0x58   :  { %2321 = vmatprep.subr.bf16.mxu0 %v3464_v33  ;;  %v3551_v33 = vld [vmem:[#allocation5 + $0x15c] ss:$28 sps:$4 sm:$0xff]  }
  0x59   :  { %v3599_v5 = vld [vmem:[#allocation5 + $0x31c] ss:$28 sps:$4 sm:$0xff]   ;;  %p3977_p13 = por %p3976_p12, %p3975_p11 }
  0x5a   :  { %2281 = vmatpush1.bf16.msra.mxu1 %v3466_v34  ;;  %v58_v34 = vld [vmem:[#allocation2 + $0x28] sm:$0xff] }
  0x5b   :  { %2322 = vmatpush1.bf16.msra.mxu0 %v3467_v35  ;;  %2282 = vmatprep.subr.bf16.mxu1 %v3468_v36  ;;  %v4076_v35 = vpack.c.bf16 %v58_v34, %v58_v34  ;;  %v3546_v36 = vld [vmem:[#allocation5 + $0x850] ss:$28 sps:$4 sm:$0xff]   ;;  %v3632_v34 = vld [vmem:[#allocation5 + $0x4a4] ss:$28 sps:$4 sm:$0xff]   ;;  %p3978_p0 = pnand %p3977_p13, %p3971_p10 }
  0x5c   :  { %2323 = vmatprep.subr.bf16.mxu0 %v3470_v37  ;;  %v3549_v37 = vld [vmem:[#allocation5 + $0x158] ss:$28 sps:$4 sm:$0xff]  }
  0x5e   :  { %2283 = vmatpush1.bf16.msra.mxu1 %v3472_v38  ;;  %v3554_v38 = vld [vmem:[#allocation5 + $0x88c] ss:$28 sps:$4 sm:$0xff]  }
  0x5f   :  { %2324 = vmatpush1.bf16.msra.mxu0 %v3473_v39  ;;  %2284 = vmatprep.subr.bf16.mxu1 %v3474_v40  ;;  %v3557_v39 = vld [vmem:[#allocation5 + $0x194] ss:$28 sps:$4 sm:$0xff]   ;;  %v3552_v40 = vld [vmem:[#allocation5 + $0x888] ss:$28 sps:$4 sm:$0xff]  }
  0x60   :  { %2325 = vmatprep.subr.bf16.mxu0 %v3476_v41  ;;  %v3555_v41 = vld [vmem:[#allocation5 + $0x190] ss:$28 sps:$4 sm:$0xff]  }
  0x62   :  { %2285 = vmatpush1.bf16.msra.mxu1 %v3478_v42  ;;  %v3560_v42 = vld [vmem:[#allocation5 + $0x8c4] ss:$28 sps:$4 sm:$0xff]  }
  0x63   :  { %2326 = vmatpush1.bf16.msra.mxu0 %v3479_v43  ;;  %2286 = vmatprep.subr.bf16.mxu1 %v3480_v44  ;;  %v3563_v43 = vld [vmem:[#allocation5 + $0x1cc] ss:$28 sps:$4 sm:$0xff]   ;;  %v3558_v44 = vld [vmem:[#allocation5 + $0x8c0] ss:$28 sps:$4 sm:$0xff]  }
  0x64   :  { %2327 = vmatprep.subr.bf16.mxu0 %v3482_v45  ;;  %v3561_v45 = vld [vmem:[#allocation5 + $0x1c8] ss:$28 sps:$4 sm:$0xff]  }
  0x66   :  { %2287 = vmatpush1.bf16.msra.mxu1 %v3484_v49  ;;  %v3564_v49 = vld [vmem:[#allocation5 + $0x8f8] ss:$28 sps:$4 sm:$0xff]  }
  0x67   :  { %2328 = vmatpush1.bf16.msra.mxu0 %v3485_v50  ;;  %2288 = vmatprep.subr.bf16.mxu1 %v3486_v52  ;;  %v3567_v50 = vld [vmem:[#allocation5 + $0x200] ss:$28 sps:$4 sm:$0xff]   ;;  %v3572_v52 = vld [vmem:[#allocation5 + $0x934] ss:$28 sps:$4 sm:$0xff]  }
  0x68   :  { %2329 = vmatprep.subr.bf16.mxu0 %v3488_v53  ;;  %v3575_v53 = vld [vmem:[#allocation5 + $0x23c] ss:$28 sps:$4 sm:$0xff]  }
  0x6a   :  { %2289 = vmatpush1.bf16.msra.mxu1 %v3490_v54  ;;  %v3570_v54 = vld [vmem:[#allocation5 + $0x930] ss:$28 sps:$4 sm:$0xff]  }
  0x6b   :  { %2330 = vmatpush1.bf16.msra.mxu0 %v3491_v55  ;;  %2290 = vmatprep.subr.bf16.mxu1 %v3492_v56  ;;  %v3573_v55 = vld [vmem:[#allocation5 + $0x238] ss:$28 sps:$4 sm:$0xff]   ;;  %v3578_v56 = vld [vmem:[#allocation5 + $0x96c] ss:$28 sps:$4 sm:$0xff]  }
  0x6c   :  { %2331 = vmatprep.subr.bf16.mxu0 %v3494_v57  ;;  %v3581_v57 = vld [vmem:[#allocation5 + $0x274] ss:$28 sps:$4 sm:$0xff]  }
  0x6e   :  { %2291 = vmatpush1.bf16.msra.mxu1 %v3496_v58  ;;  %v3576_v58 = vld [vmem:[#allocation5 + $0x968] ss:$28 sps:$4 sm:$0xff]  }
  0x6f   :  { %2332 = vmatpush1.bf16.msra.mxu0 %v3497_v59  ;;  %2292 = vmatprep.subr.bf16.mxu1 %v3498_v60  ;;  %v3579_v59 = vld [vmem:[#allocation5 + $0x270] ss:$28 sps:$4 sm:$0xff]   ;;  %v3584_v60 = vld [vmem:[#allocation5 + $0x9a4] ss:$28 sps:$4 sm:$0xff]  }
  0x70   :  { %2333 = vmatprep.subr.bf16.mxu0 %v3500_v61  ;;  %v3587_v61 = vld [vmem:[#allocation5 + $0x2ac] ss:$28 sps:$4 sm:$0xff]  }
  0x72   :  { %2293 = vmatpush1.bf16.msra.mxu1 %v3502_v62  ;;  %v3582_v62 = vld [vmem:[#allocation5 + $0x9a0] ss:$28 sps:$4 sm:$0xff]  }
  0x73   :  { %2334 = vmatpush1.bf16.msra.mxu0 %v3503_v63  ;;  %2294 = vmatprep.subr.bf16.mxu1 %v3504_v0  ;;  %v3585_v63 = vld [vmem:[#allocation5 + $0x2a8] ss:$28 sps:$4 sm:$0xff]   ;;  %v3590_v0 = vld [vmem:[#allocation5 + $0x9dc] ss:$28 sps:$4 sm:$0xff]  }
  0x74   :  { %2335 = vmatprep.subr.bf16.mxu0 %v3506_v1  ;;  %v3593_v1 = vld [vmem:[#allocation5 + $0x2e4] ss:$28 sps:$4 sm:$0xff]  }
  0x76   :  { %2295 = vmatpush1.bf16.msra.mxu1 %v3508_v2  ;;  %v3588_v2 = vld [vmem:[#allocation5 + $0x9d8] ss:$28 sps:$4 sm:$0xff]  }
  0x77   :  { %2336 = vmatpush1.bf16.msra.mxu0 %v3509_v3  ;;  %2428 = vmatprep.subr.bf16.mxu1 %v3515_v7  ;;  %v3591_v3 = vld [vmem:[#allocation5 + $0x2e0] ss:$28 sps:$4 sm:$0xff]   ;;  %v3597_v7 = vld [vmem:[#allocation5 + $0x318] ss:$28 sps:$4 sm:$0xff]  }
  0x78   :  { %2346 = vmatprep.subr.bf16.mxu0 %v3512_v4  ;;  %v3596_v4 = vld [vmem:[#allocation5 + $0xa14] ss:$28 sps:$4 sm:$0xff]  }
  0x79   :  { %2297 = vmatmul.mubr.bf16.vlgmr.msra.gmra.mrb[0].mxu1 %v4069_v10 }
  0x7a   :  { %2338 = vmatmul.mubr.bf16.vlgmr.msra.gmra.mrb[0].mxu0 %v4071_v11  ;;  %2429 = vmatpush1.bf16.msra.mxu1 %v3513_v9  ;;  %v3605_v9 = vld [vmem:[#allocation5 + $0x354] ss:$28 sps:$4 sm:$0xff]  }
  0x7b   :  { %2347 = vmatpush1.bf16.msra.mxu0 %v3510_v8  ;;  %2430 = vmatprep.subr.bf16.mxu1 %v3521_v13  ;;  %v3602_v8 = vld [vmem:[#allocation5 + $0xa4c] ss:$28 sps:$4 sm:$0xff]  }
  0x7c   :  { %2348 = vmatprep.subr.bf16.mxu0 %v3518_v12  ;;  %2460 = vmatprep.mubr.bf16.mxu1 %v4063_v47  ;;  %v3600_v12 = vld [vmem:[#allocation5 + $0xa48] ss:$28 sps:$4 sm:$0xff]   ;;  %v3603_v13 = vld [vmem:[#allocation5 + $0x350] ss:$28 sps:$4 sm:$0xff]  }
  0x7d   :  { %2378 = vmatprep.mubr.bf16.mxu0 %v4076_v35 }
  0x7e   :  { %2431 = vmatpush1.bf16.msra.mxu1 %v3519_v15  ;;  %v3608_v15 = vld [vmem:[#allocation5 + $0xa84] ss:$28 sps:$4 sm:$0xff]  }
  0x7f   :  { %2349 = vmatpush1.bf16.msra.mxu0 %v3516_v14  ;;  %2432 = vmatprep.subr.bf16.mxu1 %v3527_v17  ;;  %v57_v14 = vld [vmem:[#allocation2 + $0x20] sm:$0xff] }
  0x80   :  { %2350 = vmatprep.subr.bf16.mxu0 %v3524_v16  ;;  %v3611_v16 = vld [vmem:[#allocation5 + $0x38c] ss:$28 sps:$4 sm:$0xff]   ;;  %v4079_v17 = vpack.c.bf16 %v57_v14, %v57_v14  ;;  %v3689_v14 = vld [vmem:[#allocation5 + $0x244] ss:$28 sps:$4 sm:$0xff]  }
  0x82   :  { %2433 = vmatpush1.bf16.msra.mxu1 %v3525_v19  ;;  %v3609_v19 = vld [vmem:[#allocation5 + $0x388] ss:$28 sps:$4 sm:$0xff]  }
  0x83   :  { %2351 = vmatpush1.bf16.msra.mxu0 %v3522_v18  ;;  %2434 = vmatprep.subr.bf16.mxu1 %v3533_v21  ;;  %v3606_v18 = vld [vmem:[#allocation5 + $0xa80] ss:$28 sps:$4 sm:$0xff]   ;;  %v3623_v21 = vld [vmem:[#allocation5 + $0xa8c] ss:$28 sps:$4 sm:$0xff]  }
  0x84   :  { %2352 = vmatprep.subr.bf16.mxu0 %v3530_v20  ;;  %v3614_v20 = vld [vmem:[#allocation5 + $0x3c4] ss:$28 sps:$4 sm:$0xff]  }
  0x86   :  { %2435 = vmatpush1.bf16.msra.mxu1 %v3531_v23  ;;  %v3617_v23 = vld [vmem:[#allocation5 + $0x3fc] ss:$28 sps:$4 sm:$0xff]  }
  0x87   :  { %2353 = vmatpush1.bf16.msra.mxu0 %v3528_v22  ;;  %2436 = vmatprep.subr.bf16.mxu1 %v3539_v25  ;;  %v3612_v22 = vld [vmem:[#allocation5 + $0x3c0] ss:$28 sps:$4 sm:$0xff]   ;;  %v3615_v25 = vld [vmem:[#allocation5 + $0x3f8] ss:$28 sps:$4 sm:$0xff]  }
  0x88   :  { %2354 = vmatprep.subr.bf16.mxu0 %v3536_v24  ;;  %v4003_v24 = vmov 0  }
  0x8a   :  { %2437 = vmatpush1.bf16.msra.mxu1 %v3537_v27  ;;  %v3620_v27 = vld [vmem:[#allocation5 + $0x434] ss:$28 sps:$4 sm:$0xff]  }
  0x8b   :  { %2355 = vmatpush1.bf16.msra.mxu0 %v3534_v26  ;;  %2438 = vmatprep.subr.bf16.mxu1 %v3545_v29  ;;  %v59_v26 = vld [vmem:[#allocation2 + $0x30] sm:$0xff]  ;;  %v3618_v29 = vld [vmem:[#allocation5 + $0x430] ss:$28 sps:$4 sm:$0xff]  }
  0x8c   :  { %2356 = vmatprep.subr.bf16.mxu0 %v3542_v28  ;;  %v4085_v28 = vpack.c.bf16 %v59_v26, %v59_v26  ;;  %v3699_v26 = vld [vmem:[#allocation5 + $0x2b0] ss:$28 sps:$4 sm:$0xff]  }
  0x8e   :  { %2439 = vmatpush1.bf16.msra.mxu1 %v3543_v31  ;;  %v3626_v31 = vld [vmem:[#allocation5 + $0x46c] ss:$28 sps:$4 sm:$0xff]  }
  0x8f   :  { %2357 = vmatpush1.bf16.msra.mxu0 %v3540_v30  ;;  %2440 = vmatprep.subr.bf16.mxu1 %v3551_v33  ;;  %v3621_v30 = vld [vmem:[#allocation5 + $0xa88] ss:$28 sps:$4 sm:$0xff]  }
  0x90   :  { %2358 = vmatprep.subr.bf16.mxu0 %v3548_v32  ;;  %v3629_v32 = vld [vmem:[#allocation5 + $0x14] ss:$28 sps:$4 sm:$0xff]   ;;  %v3624_v33 = vld [vmem:[#allocation5 + $0x468] ss:$28 sps:$4 sm:$0xff]  }
  0x92   :  { %2441 = vmatpush1.bf16.msra.mxu1 %v3549_v37  ;;  %v3630_v37 = vld [vmem:[#allocation5 + $0x4a0] ss:$28 sps:$4 sm:$0xff]  }
  0x93   :  { %2359 = vmatpush1.bf16.msra.mxu0 %v3546_v36  ;;  %2442 = vmatprep.subr.bf16.mxu1 %v3557_v39  ;;  %v3627_v36 = vld [vmem:[#allocation5 + $0x10] ss:$28 sps:$4 sm:$0xff]   ;;  %v3638_v39 = vld [vmem:[#allocation5 + $0x4dc] ss:$28 sps:$4 sm:$0xff]  }
  0x94   :  { %2360 = vmatprep.subr.bf16.mxu0 %v3554_v38  ;;  %v3635_v38 = vld [vmem:[#allocation5 + $0x4c] ss:$28 sps:$4 sm:$0xff]  }
  0x96   :  { %2443 = vmatpush1.bf16.msra.mxu1 %v3555_v41  ;;  %v3636_v41 = vld [vmem:[#allocation5 + $0x4d8] ss:$28 sps:$4 sm:$0xff]  }
  0x97   :  { %2361 = vmatpush1.bf16.msra.mxu0 %v3552_v40  ;;  %2444 = vmatprep.subr.bf16.mxu1 %v3563_v43  ;;  %v3633_v40 = vld [vmem:[#allocation5 + $0x48] ss:$28 sps:$4 sm:$0xff]   ;;  %v3644_v43 = vld [vmem:[#allocation5 + $0x514] ss:$28 sps:$4 sm:$0xff]  }
  0x98   :  { %2362 = vmatprep.subr.bf16.mxu0 %v3560_v42  ;;  %v3641_v42 = vld [vmem:[#allocation5 + $0x84] ss:$28 sps:$4 sm:$0xff]  }
  0x9a   :  { %2445 = vmatpush1.bf16.msra.mxu1 %v3561_v45  ;;  %v3642_v45 = vld [vmem:[#allocation5 + $0x510] ss:$28 sps:$4 sm:$0xff]  }
  0x9b   :  { %2363 = vmatpush1.bf16.msra.mxu0 %v3558_v44  ;;  %2446 = vmatprep.subr.bf16.mxu1 %v3569_v48  ;;  %v3639_v44 = vld [vmem:[#allocation5 + $0x80] ss:$28 sps:$4 sm:$0xff]   ;;  %v3650_v48 = vld [vmem:[#allocation5 + $0x54c] ss:$28 sps:$4 sm:$0xff]  }
  0x9c   :  { %2364 = vmatprep.subr.bf16.mxu0 %v3566_v46  ;;  %v3647_v46 = vld [vmem:[#allocation5 + $0xbc] ss:$28 sps:$4 sm:$0xff]  }
  0x9e   :  { %2447 = vmatpush1.bf16.msra.mxu1 %v3567_v50  ;;  %v3648_v50 = vld [vmem:[#allocation5 + $0x548] ss:$28 sps:$4 sm:$0xff]  }
  0x9f   :  { %2365 = vmatpush1.bf16.msra.mxu0 %v3564_v49  ;;  %2448 = vmatprep.subr.bf16.mxu1 %v3575_v53  ;;  %v3645_v49 = vld [vmem:[#allocation5 + $0xb8] ss:$28 sps:$4 sm:$0xff]   ;;  %v3656_v53 = vld [vmem:[#allocation5 + $0x584] ss:$28 sps:$4 sm:$0xff]  }
  0xa0   :  { %2366 = vmatprep.subr.bf16.mxu0 %v3572_v52  ;;  %v3653_v52 = vld [vmem:[#allocation5 + $0xf4] ss:$28 sps:$4 sm:$0xff]  }
  0xa2   :  { %2449 = vmatpush1.bf16.msra.mxu1 %v3573_v55  ;;  %v3654_v55 = vld [vmem:[#allocation5 + $0x580] ss:$28 sps:$4 sm:$0xff]  }
  0xa3   :  { %2367 = vmatpush1.bf16.msra.mxu0 %v3570_v54  ;;  %2450 = vmatprep.subr.bf16.mxu1 %v3581_v57  ;;  %v3651_v54 = vld [vmem:[#allocation5 + $0xf0] ss:$28 sps:$4 sm:$0xff]   ;;  %v3662_v57 = vld [vmem:[#allocation5 + $0x5bc] ss:$28 sps:$4 sm:$0xff]  }
  0xa4   :  { %2368 = vmatprep.subr.bf16.mxu0 %v3578_v56  ;;  %v3659_v56 = vld [vmem:[#allocation5 + $0x12c] ss:$28 sps:$4 sm:$0xff]  }
  0xa6   :  { %2451 = vmatpush1.bf16.msra.mxu1 %v3579_v59  ;;  %v3660_v59 = vld [vmem:[#allocation5 + $0x5b8] ss:$28 sps:$4 sm:$0xff]  }
  0xa7   :  { %2369 = vmatpush1.bf16.msra.mxu0 %v3576_v58  ;;  %2452 = vmatprep.subr.bf16.mxu1 %v3587_v61  ;;  %v3657_v58 = vld [vmem:[#allocation5 + $0x128] ss:$28 sps:$4 sm:$0xff]   ;;  %v3668_v61 = vld [vmem:[#allocation5 + $0x5f4] ss:$28 sps:$4 sm:$0xff]  }
  0xa8   :  { %2370 = vmatprep.subr.bf16.mxu0 %v3584_v60  ;;  %v3665_v60 = vld [vmem:[#allocation5 + $0x164] ss:$28 sps:$4 sm:$0xff]  }
  0xaa   :  { %2453 = vmatpush1.bf16.msra.mxu1 %v3585_v63  ;;  %v3666_v63 = vld [vmem:[#allocation5 + $0x5f0] ss:$28 sps:$4 sm:$0xff]  }
  0xab   :  { %2371 = vmatpush1.bf16.msra.mxu0 %v3582_v62  ;;  %2454 = vmatprep.subr.bf16.mxu1 %v3593_v1  ;;  %v3663_v62 = vld [vmem:[#allocation5 + $0x160] ss:$28 sps:$4 sm:$0xff]   ;;  %v3674_v1 = vld [vmem:[#allocation5 + $0x62c] ss:$28 sps:$4 sm:$0xff]  }
  0xac   :  { %2372 = vmatprep.subr.bf16.mxu0 %v3590_v0  ;;  %v3671_v0 = vld [vmem:[#allocation5 + $0x19c] ss:$28 sps:$4 sm:$0xff]  }
  0xae   :  { %2455 = vmatpush1.bf16.msra.mxu1 %v3591_v3  ;;  %v3672_v3 = vld [vmem:[#allocation5 + $0x628] ss:$28 sps:$4 sm:$0xff]  }
  0xaf   :  { %2373 = vmatpush1.bf16.msra.mxu0 %v3588_v2  ;;  %2456 = vmatprep.subr.bf16.mxu1 %v3599_v5  ;;  %v3669_v2 = vld [vmem:[#allocation5 + $0x198] ss:$28 sps:$4 sm:$0xff]   ;;  %v3680_v5 = vld [vmem:[#allocation5 + $0x664] ss:$28 sps:$4 sm:$0xff]  }
  0xb0   :  { %2374 = vmatprep.subr.bf16.mxu0 %v3596_v4  ;;  %v3677_v4 = vld [vmem:[#allocation5 + $0x1d4] ss:$28 sps:$4 sm:$0xff]  }
  0xb2   :  { %2457 = vmatpush1.bf16.msra.mxu1 %v3597_v7  ;;  %v3678_v7 = vld [vmem:[#allocation5 + $0x660] ss:$28 sps:$4 sm:$0xff]  }
  0xb3   :  { %2375 = vmatpush1.bf16.msra.mxu0 %v3594_v6  ;;  %2458 = vmatprep.subr.bf16.mxu1 %v3605_v9  ;;  %v3675_v6 = vld [vmem:[#allocation5 + $0x1d0] ss:$28 sps:$4 sm:$0xff]   ;;  %v3686_v9 = vld [vmem:[#allocation5 + $0x69c] ss:$28 sps:$4 sm:$0xff]  }
  0xb4   :  { %2376 = vmatprep.subr.bf16.mxu0 %v3602_v8  ;;  %v3683_v8 = vld [vmem:[#allocation5 + $0x20c] ss:$28 sps:$4 sm:$0xff]  }
  0xb6   :  { %2459 = vmatpush1.bf16.msra.mxu1 %v3603_v13  ;;  %v3684_v13 = vld [vmem:[#allocation5 + $0x698] ss:$28 sps:$4 sm:$0xff]  }
  0xb7   :  { %2377 = vmatpush1.bf16.msra.mxu0 %v3600_v12  ;;  %2469 = vmatprep.subr.bf16.mxu1 %v3611_v16  ;;  %v3681_v12 = vld [vmem:[#allocation5 + $0x208] ss:$28 sps:$4 sm:$0xff]   ;;  %v3687_v16 = vld [vmem:[#allocation5 + $0x240] ss:$28 sps:$4 sm:$0xff]  }
  0xb8   :  { %2387 = vmatprep.subr.bf16.mxu0 %v3608_v15  ;;  %v3692_v15 = vld [vmem:[#allocation5 + $0x6d4] ss:$28 sps:$4 sm:$0xff]  }
  0xb9   :  { %2461 = vmatmul.mubr.bf16.vlgmr.msra.gmra.mrb[4].mxu1 %v4069_v10 }
  0xba   :  { %2379 = vmatmul.mubr.bf16.vlgmr.msra.gmra.mrb[0].mxu0 %v4079_v17  ;;  %2470 = vmatpush1.bf16.msra.mxu1 %v3609_v19  ;;  %v3695_v19 = vld [vmem:[#allocation5 + $0x27c] ss:$28 sps:$4 sm:$0xff]  }
  0xbb   :  { %2388 = vmatpush1.bf16.msra.mxu0 %v3606_v18  ;;  %2471 = vmatprep.subr.bf16.mxu1 %v3614_v20  ;;  %v3690_v18 = vld [vmem:[#allocation5 + $0x6d0] ss:$28 sps:$4 sm:$0xff]  }
  0xbc   :  { %2419 = vmatprep.mubr.bf16.mxu0 %v4003_v24  ;;  %2551 = vmatprep.subr.bf16.mxu0 %v3623_v21  ;;  %v3698_v20 = vld [vmem:[#allocation5 + $0x70c] ss:$28 sps:$4 sm:$0xff]   ;;  %v3693_v21 = vld [vmem:[#allocation5 + $0x278] ss:$28 sps:$4 sm:$0xff]  }
  0xbd   :  { %2501 = vmatprep.mubr.bf16.mxu1 %v4065_v51 }
  0xbe   :  { %2472 = vmatpush1.bf16.msra.mxu1 %v3612_v22  ;;  %v3696_v22 = vld [vmem:[#allocation5 + $0x708] ss:$28 sps:$4 sm:$0xff]  }
  0xbf   :  { %2473 = vmatprep.subr.bf16.mxu1 %v3617_v23  ;;  %v3701_v23 = vld [vmem:[#allocation5 + $0x2b4] ss:$28 sps:$4 sm:$0xff]  }
  0xc2   :  { %2474 = vmatpush1.bf16.msra.mxu1 %v3615_v25  ;;  %v3704_v25 = vld [vmem:[#allocation5 + $0x744] ss:$28 sps:$4 sm:$0xff]  }
  0xc3   :  { %2475 = vmatprep.subr.bf16.mxu1 %v3620_v27  ;;  %v3702_v27 = vld [vmem:[#allocation5 + $0x740] ss:$28 sps:$4 sm:$0xff]  }
  0xc6   :  { %3289 = vmatmul.mubr.msk.bf16.vlgmr.msra.gmra.mrb[0].mxu0 %vm2260_vm0, %v4085_v28  ;;  %2476 = vmatpush1.bf16.msra.mxu1 %v3618_v29  ;;  %v3707_v29 = vld [vmem:[#allocation5 + $0x2ec] ss:$28 sps:$4 sm:$0xff]  }
  0xc7   :  { %2552 = vmatpush1.bf16.msra.mxu0 %v3621_v30  ;;  %2477 = vmatprep.subr.bf16.mxu1 %v3626_v31  ;;  %v3710_v30 = vld [vmem:[#allocation5 + $0x77c] ss:$28 sps:$4 sm:$0xff]   ;;  %v3705_v31 = vld [vmem:[#allocation5 + $0x2e8] ss:$28 sps:$4 sm:$0xff]  }
  0xc8   :  { %2583 = vmatprep.mubr.bf16.mxu0 %v4003_v24  ;;  %2592 = vmatprep.subr.bf16.mxu0 %v3629_v32  ;;  %v3708_v32 = vld [vmem:[#allocation5 + $0x778] ss:$28 sps:$4 sm:$0xff]  }
  0xca   :  { %2478 = vmatpush1.bf16.msra.mxu1 %v3624_v33  ;;  %v3713_v33 = vld [vmem:[#allocation5 + $0x324] ss:$28 sps:$4 sm:$0xff]  }
  0xcb   :  { %2479 = vmatprep.subr.bf16.mxu1 %v3632_v34  ;;  %v3716_v34 = vld [vmem:[#allocation5 + $0x7b4] ss:$28 sps:$4 sm:$0xff]  }
  0xce   :  { %3290 = vmatmul.mubr.msk.bf16.vlgmr.msra.gmra.mrb[4].mxu0 %vm2260_vm0, %v4085_v28  ;;  %2480 = vmatpush1.bf16.msra.mxu1 %v3630_v37  ;;  %v3714_v37 = vld [vmem:[#allocation5 + $0x7b0] ss:$28 sps:$4 sm:$0xff]  }
  0xcf   :  { %2593 = vmatpush1.bf16.msra.mxu0 %v3627_v36  ;;  %2481 = vmatprep.subr.bf16.mxu1 %v3638_v39  ;;  %v3711_v36 = vld [vmem:[#allocation5 + $0x320] ss:$28 sps:$4 sm:$0xff]   ;;  %v3722_v39 = vld [vmem:[#allocation5 + $0x7ec] ss:$28 sps:$4 sm:$0xff]  }
  0xd0   :  { %2594 = vmatprep.subr.bf16.mxu0 %v3635_v38  ;;  %2624 = vmatprep.mubr.bf16.mxu0 %v4063_v47  ;;  %v3719_v38 = vld [vmem:[#allocation5 + $0x35c] ss:$28 sps:$4 sm:$0xff]  }
  0xd2   :  { %2482 = vmatpush1.bf16.msra.mxu1 %v3636_v41  ;;  %v3720_v41 = vld [vmem:[#allocation5 + $0x7e8] ss:$28 sps:$4 sm:$0xff]  }
  0xd3   :  { %2595 = vmatpush1.bf16.msra.mxu0 %v3633_v40  ;;  %2483 = vmatprep.subr.bf16.mxu1 %v3644_v43  ;;  %v3717_v40 = vld [vmem:[#allocation5 + $0x358] ss:$28 sps:$4 sm:$0xff]   ;;  %v3728_v43 = vld [vmem:[#allocation5 + $0x824] ss:$28 sps:$4 sm:$0xff]  }
  0xd4   :  { %2596 = vmatprep.subr.bf16.mxu0 %v3641_v42  ;;  %v3725_v42 = vld [vmem:[#allocation5 + $0x394] ss:$28 sps:$4 sm:$0xff]  }
  0xd6   :  { %2484 = vmatpush1.bf16.msra.mxu1 %v3642_v45  ;;  %v3726_v45 = vld [vmem:[#allocation5 + $0x820] ss:$28 sps:$4 sm:$0xff]  }
  0xd7   :  { %2597 = vmatpush1.bf16.msra.mxu0 %v3639_v44  ;;  %2485 = vmatprep.subr.bf16.mxu1 %v3650_v48  ;;  %v3723_v44 = vld [vmem:[#allocation5 + $0x390] ss:$28 sps:$4 sm:$0xff]   ;;  %v3734_v48 = vld [vmem:[#allocation5 + $0x85c] ss:$28 sps:$4 sm:$0xff]  }
  0xd8   :  { %2598 = vmatprep.subr.bf16.mxu0 %v3647_v46  ;;  %v3731_v46 = vld [vmem:[#allocation5 + $0x3cc] ss:$28 sps:$4 sm:$0xff]  }
  0xda   :  { %2486 = vmatpush1.bf16.msra.mxu1 %v3648_v50  ;;  %v3732_v50 = vld [vmem:[#allocation5 + $0x858] ss:$28 sps:$4 sm:$0xff]  }
  0xdb   :  { %2599 = vmatpush1.bf16.msra.mxu0 %v3645_v49  ;;  %2487 = vmatprep.subr.bf16.mxu1 %v3656_v53  ;;  %v3729_v49 = vld [vmem:[#allocation5 + $0x3c8] ss:$28 sps:$4 sm:$0xff]   ;;  %v3740_v53 = vld [vmem:[#allocation5 + $0x894] ss:$28 sps:$4 sm:$0xff]  }
  0xdc   :  { %2600 = vmatprep.subr.bf16.mxu0 %v3653_v52  ;;  %v3737_v52 = vld [vmem:[#allocation5 + $0x404] ss:$28 sps:$4 sm:$0xff]  }
  0xde   :  { %2488 = vmatpush1.bf16.msra.mxu1 %v3654_v55  ;;  %v3738_v55 = vld [vmem:[#allocation5 + $0x890] ss:$28 sps:$4 sm:$0xff]  }
  0xdf   :  { %2601 = vmatpush1.bf16.msra.mxu0 %v3651_v54  ;;  %2489 = vmatprep.subr.bf16.mxu1 %v3662_v57  ;;  %v3735_v54 = vld [vmem:[#allocation5 + $0x400] ss:$28 sps:$4 sm:$0xff]   ;;  %v3746_v57 = vld [vmem:[#allocation5 + $0x8cc] ss:$28 sps:$4 sm:$0xff]  }
  0xe0   :  { %2602 = vmatprep.subr.bf16.mxu0 %v3659_v56  ;;  %v3743_v56 = vld [vmem:[#allocation5 + $0x43c] ss:$28 sps:$4 sm:$0xff]  }
  0xe2   :  { %2490 = vmatpush1.bf16.msra.mxu1 %v3660_v59  ;;  %v3744_v59 = vld [vmem:[#allocation5 + $0x8c8] ss:$28 sps:$4 sm:$0xff]  }
  0xe3   :  { %2603 = vmatpush1.bf16.msra.mxu0 %v3657_v58  ;;  %2491 = vmatprep.subr.bf16.mxu1 %v3668_v61  ;;  %v3741_v58 = vld [vmem:[#allocation5 + $0x438] ss:$28 sps:$4 sm:$0xff]   ;;  %v3752_v61 = vld [vmem:[#allocation5 + $0x904] ss:$28 sps:$4 sm:$0xff]  }
  0xe4   :  { %2604 = vmatprep.subr.bf16.mxu0 %v3665_v60  ;;  %v3749_v60 = vld [vmem:[#allocation5 + $0x474] ss:$28 sps:$4 sm:$0xff]  }
  0xe6   :  { %2492 = vmatpush1.bf16.msra.mxu1 %v3666_v63  ;;  %v3750_v63 = vld [vmem:[#allocation5 + $0x900] ss:$28 sps:$4 sm:$0xff]  }
  0xe7   :  { %2605 = vmatpush1.bf16.msra.mxu0 %v3663_v62  ;;  %2493 = vmatprep.subr.bf16.mxu1 %v3674_v1  ;;  %v3747_v62 = vld [vmem:[#allocation5 + $0x470] ss:$28 sps:$4 sm:$0xff]   ;;  %v3758_v1 = vld [vmem:[#allocation5 + $0x93c] ss:$28 sps:$4 sm:$0xff]  }
  0xe8   :  { %2606 = vmatprep.subr.bf16.mxu0 %v3671_v0  ;;  %v3755_v0 = vld [vmem:[#allocation5 + $0x4ac] ss:$28 sps:$4 sm:$0xff]  }
  0xea   :  { %2494 = vmatpush1.bf16.msra.mxu1 %v3672_v3  ;;  %v3756_v3 = vld [vmem:[#allocation5 + $0x938] ss:$28 sps:$4 sm:$0xff]  }
  0xeb   :  { %2607 = vmatpush1.bf16.msra.mxu0 %v3669_v2  ;;  %2495 = vmatprep.subr.bf16.mxu1 %v3680_v5  ;;  %v3753_v2 = vld [vmem:[#allocation5 + $0x4a8] ss:$28 sps:$4 sm:$0xff]   ;;  %v3764_v5 = vld [vmem:[#allocation5 + $0x974] ss:$28 sps:$4 sm:$0xff]  }
  0xec   :  { %2608 = vmatprep.subr.bf16.mxu0 %v3677_v4  ;;  %v3761_v4 = vld [vmem:[#allocation5 + $0x4e4] ss:$28 sps:$4 sm:$0xff]  }
  0xee   :  { %2496 = vmatpush1.bf16.msra.mxu1 %v3678_v7  ;;  %v3762_v7 = vld [vmem:[#allocation5 + $0x970] ss:$28 sps:$4 sm:$0xff]  }
  0xef   :  { %2609 = vmatpush1.bf16.msra.mxu0 %v3675_v6  ;;  %2497 = vmatprep.subr.bf16.mxu1 %v3686_v9  ;;  %v3759_v6 = vld [vmem:[#allocation5 + $0x4e0] ss:$28 sps:$4 sm:$0xff]   ;;  %v3770_v9 = vld [vmem:[#allocation5 + $0x9ac] ss:$28 sps:$4 sm:$0xff]  }
  0xf0   :  { %2610 = vmatprep.subr.bf16.mxu0 %v3683_v8  ;;  %v3767_v8 = vld [vmem:[#allocation5 + $0x51c] ss:$28 sps:$4 sm:$0xff]  }
  0xf2   :  { %2498 = vmatpush1.bf16.msra.mxu1 %v3684_v13  ;;  %v3768_v13 = vld [vmem:[#allocation5 + $0x9a8] ss:$28 sps:$4 sm:$0xff]  }
  0xf3   :  { %2611 = vmatpush1.bf16.msra.mxu0 %v3681_v12  ;;  %2499 = vmatprep.subr.bf16.mxu1 %v3692_v15  ;;  %v3765_v12 = vld [vmem:[#allocation5 + $0x518] ss:$28 sps:$4 sm:$0xff]   ;;  %v3776_v15 = vld [vmem:[#allocation5 + $0x9e4] ss:$28 sps:$4 sm:$0xff]  }
  0xf4   :  { %2612 = vmatprep.subr.bf16.mxu0 %v3689_v14  ;;  %v3773_v14 = vld [vmem:[#allocation5 + $0x554] ss:$28 sps:$4 sm:$0xff]  }
  0xf6   :  { %2500 = vmatpush1.bf16.msra.mxu1 %v3690_v18  ;;  %v3774_v18 = vld [vmem:[#allocation5 + $0x9e0] ss:$28 sps:$4 sm:$0xff]  }
  0xf7   :  { %2613 = vmatpush1.bf16.msra.mxu0 %v3687_v16  ;;  %2510 = vmatprep.subr.bf16.mxu1 %v3698_v20  ;;  %v3771_v16 = vld [vmem:[#allocation5 + $0x550] ss:$28 sps:$4 sm:$0xff]   ;;  %v3782_v20 = vld [vmem:[#allocation5 + $0xa1c] ss:$28 sps:$4 sm:$0xff]  }
  0xf8   :  { %2614 = vmatprep.subr.bf16.mxu0 %v3695_v19  ;;  %v3779_v19 = vld [vmem:[#allocation5 + $0x58c] ss:$28 sps:$4 sm:$0xff]  }
  0xf9   :  { %2502 = vmatmul.mubr.bf16.vlgmr.msra.gmra.mrb[4].mxu1 %v4071_v11 }
  0xfa   :  { %2511 = vmatpush1.bf16.msra.mxu1 %v3696_v22  ;;  %2542 = vmatprep.mubr.bf16.mxu1 %v4076_v35  ;;  %v3780_v22 = vld [vmem:[#allocation5 + $0xa18] ss:$28 sps:$4 sm:$0xff]  }
  0xfb   :  { %2615 = vmatpush1.bf16.msra.mxu0 %v3693_v21  ;;  %2512 = vmatprep.subr.bf16.mxu1 %v3704_v25  ;;  %v3777_v21 = vld [vmem:[#allocation5 + $0x588] ss:$28 sps:$4 sm:$0xff]   ;;  %v3788_v25 = vld [vmem:[#allocation5 + $0xa54] ss:$28 sps:$4 sm:$0xff]  }
  0xfc   :  { %2616 = vmatprep.subr.bf16.mxu0 %v3701_v23  ;;  %v3785_v23 = vld [vmem:[#allocation5 + $0x5c4] ss:$28 sps:$4 sm:$0xff]  }
  0xfe   :  { %2513 = vmatpush1.bf16.msra.mxu1 %v3702_v27  ;;  %v3786_v27 = vld [vmem:[#allocation5 + $0xa50] ss:$28 sps:$4 sm:$0xff]  }
  0xff   :  { %2617 = vmatpush1.bf16.msra.mxu0 %v3699_v26  ;;  %2514 = vmatprep.subr.bf16.mxu1 %v3710_v30  ;;  %v3783_v26 = vld [vmem:[#allocation5 + $0x5c0] ss:$28 sps:$4 sm:$0xff]   ;;  %v3792_v30 = vld [vmem:[#allocation5 + $0x1d8] ss:$28 sps:$4 sm:$0xff]  }
 0x100   :  { %2618 = vmatprep.subr.bf16.mxu0 %v3707_v29  ;;  %v3791_v29 = vld [vmem:[#allocation5 + $0x5fc] ss:$28 sps:$4 sm:$0xff]  }
 0x102   :  { %2515 = vmatpush1.bf16.msra.mxu1 %v3708_v32  ;;  %v3793_v32 = vld [vmem:[#allocation5 + $0x18] ss:$28 sps:$4 sm:$0xff]  }
 0x103   :  { %2619 = vmatpush1.bf16.msra.mxu0 %v3705_v31  ;;  %2516 = vmatprep.subr.bf16.mxu1 %v3716_v34  ;;  %v3789_v31 = vld [vmem:[#allocation5 + $0x5f8] ss:$28 sps:$4 sm:$0xff]   ;;  %v3797_v34 = vld [vmem:[#allocation5 + $0x210] ss:$28 sps:$4 sm:$0xff]  }
 0x104   :  { %2620 = vmatprep.subr.bf16.mxu0 %v3713_v33  ;;  %v3796_v33 = vld [vmem:[#allocation5 + $0x634] ss:$28 sps:$4 sm:$0xff]  }
 0x106   :  { %2517 = vmatpush1.bf16.msra.mxu1 %v3714_v37  ;;  %v3798_v37 = vld [vmem:[#allocation5 + $0x50] ss:$28 sps:$4 sm:$0xff]  }
 0x107   :  { %2621 = vmatpush1.bf16.msra.mxu0 %v3711_v36  ;;  %2518 = vmatprep.subr.bf16.mxu1 %v3722_v39  ;;  %v3794_v36 = vld [vmem:[#allocation5 + $0x630] ss:$28 sps:$4 sm:$0xff]   ;;  %v3802_v39 = vld [vmem:[#allocation5 + $0x248] ss:$28 sps:$4 sm:$0xff]  }
 0x108   :  { %2622 = vmatprep.subr.bf16.mxu0 %v3719_v38  ;;  %v3801_v38 = vld [vmem:[#allocation5 + $0x66c] ss:$28 sps:$4 sm:$0xff]  }
 0x10a   :  { %2519 = vmatpush1.bf16.msra.mxu1 %v3720_v41  ;;  %v3803_v41 = vld [vmem:[#allocation5 + $0x88] ss:$28 sps:$4 sm:$0xff]  }
 0x10b   :  { %2623 = vmatpush1.bf16.msra.mxu0 %v3717_v40  ;;  %2520 = vmatprep.subr.bf16.mxu1 %v3728_v43  ;;  %v3799_v40 = vld [vmem:[#allocation5 + $0x668] ss:$28 sps:$4 sm:$0xff]   ;;  %v3807_v43 = vld [vmem:[#allocation5 + $0x280] ss:$28 sps:$4 sm:$0xff]  }
 0x10c   :  { %2633 = vmatprep.subr.bf16.mxu0 %v3725_v42  ;;  %v3806_v42 = vld [vmem:[#allocation5 + $0x6a4] ss:$28 sps:$4 sm:$0xff]  }
 0x10e   :  { %2625 = vmatmul.mubr.bf16.vlgmr.msra.gmra.mrb[8].mxu0 %v4069_v10  ;;  %2521 = vmatpush1.bf16.msra.mxu1 %v3726_v45  ;;  %v3808_v45 = vld [vmem:[#allocation5 + $0xc0] ss:$28 sps:$4 sm:$0xff]  }
 0x10f   :  { %2634 = vmatpush1.bf16.msra.mxu0 %v3723_v44  ;;  %2522 = vmatprep.subr.bf16.mxu1 %v3734_v48  ;;  %v3804_v44 = vld [vmem:[#allocation5 + $0x6a0] ss:$28 sps:$4 sm:$0xff]   ;;  %v3812_v48 = vld [vmem:[#allocation5 + $0x2b8] ss:$28 sps:$4 sm:$0xff]  }
 0x110   :  { %2635 = vmatprep.subr.bf16.mxu0 %v3731_v46  ;;  %2665 = vmatprep.mubr.bf16.mxu0 %v4065_v51  ;;  %v3811_v46 = vld [vmem:[#allocation5 + $0x6dc] ss:$28 sps:$4 sm:$0xff]  }
 0x112   :  { %2523 = vmatpush1.bf16.msra.mxu1 %v3732_v50  ;;  %v3816_v50 = vld [vmem:[#allocation5 + $0x714] ss:$28 sps:$4 sm:$0xff]  }
 0x113   :  { %2636 = vmatpush1.bf16.msra.mxu0 %v3729_v49  ;;  %2524 = vmatprep.subr.bf16.mxu1 %v3740_v53  ;;  %v3809_v49 = vld [vmem:[#allocation5 + $0x6d8] ss:$28 sps:$4 sm:$0xff]   ;;  %v3814_v53 = vld [vmem:[#allocation5 + $0x710] ss:$28 sps:$4 sm:$0xff]  }
 0x114   :  { %2637 = vmatprep.subr.bf16.mxu0 %v3737_v52  ;;  %v3817_v52 = vld [vmem:[#allocation5 + $0x2f0] ss:$28 sps:$4 sm:$0xff]  }
 0x116   :  { %2525 = vmatpush1.bf16.msra.mxu1 %v3738_v55  ;;  %v3821_v55 = vld [vmem:[#allocation5 + $0x74c] ss:$28 sps:$4 sm:$0xff]  }
 0x117   :  { %2638 = vmatpush1.bf16.msra.mxu0 %v3735_v54  ;;  %2526 = vmatprep.subr.bf16.mxu1 %v3746_v57  ;;  %v3818_v54 = vld [vmem:[#allocation5 + $0x130] ss:$28 sps:$4 sm:$0xff]  }
 0x118   :  { %2639 = vmatprep.subr.bf16.mxu0 %v3743_v56  ;;  %v3822_v56 = vld [vmem:[#allocation5 + $0x328] ss:$28 sps:$4 sm:$0xff]  }
 0x11a   :  { %2527 = vmatpush1.bf16.msra.mxu1 %v3744_v59 }
 0x11b   :  { %2640 = vmatpush1.bf16.msra.mxu0 %v3741_v58  ;;  %2528 = vmatprep.subr.bf16.mxu1 %v3752_v61  ;;  %v3823_v61 = vld [vmem:[#allocation5 + $0x168] ss:$28 sps:$4 sm:$0xff]  }
 0x11c   :  { %2641 = vmatprep.subr.bf16.mxu0 %v3749_v60  ;;  %v3819_v60 = vld [vmem:[#allocation5 + $0x748] ss:$28 sps:$4 sm:$0xff]  }
 0x11e   :  { %2529 = vmatpush1.bf16.msra.mxu1 %v3750_v63  ;;  %v3826_v63 = vld [vmem:[#allocation5 + $0x784] ss:$28 sps:$4 sm:$0xff]  }
 0x11f   :  { %2642 = vmatpush1.bf16.msra.mxu0 %v3747_v62  ;;  %2530 = vmatprep.subr.bf16.mxu1 %v3758_v1  ;;  %v3824_v1 = vld [vmem:[#allocation5 + $0x780] ss:$28 sps:$4 sm:$0xff]  }
 0x120   :  { %2643 = vmatprep.subr.bf16.mxu0 %v3755_v0  ;;  %v3827_v0 = vld [vmem:[#allocation5 + $0x360] ss:$28 sps:$4 sm:$0xff]  }
 0x122   :  { %2531 = vmatpush1.bf16.msra.mxu1 %v3756_v3  ;;  %v3831_v3 = vld [vmem:[#allocation5 + $0x7bc] ss:$28 sps:$4 sm:$0xff]  }
 0x123   :  { %2644 = vmatpush1.bf16.msra.mxu0 %v3753_v2  ;;  %2532 = vmatprep.subr.bf16.mxu1 %v3764_v5  ;;  %v3828_v2 = vld [vmem:[#allocation5 + $0x1a0] ss:$28 sps:$4 sm:$0xff]   ;;  %v3829_v5 = vld [vmem:[#allocation5 + $0x7b8] ss:$28 sps:$4 sm:$0xff]  }
 0x124   :  { %2645 = vmatprep.subr.bf16.mxu0 %v3761_v4  ;;  %v3832_v4 = vld [vmem:[#allocation5 + $0x558] ss:$28 sps:$4 sm:$0xff]  }
 0x126   :  { %2533 = vmatpush1.bf16.msra.mxu1 %v3762_v7  ;;  %v3836_v7 = vld [vmem:[#allocation5 + $0x7f4] ss:$28 sps:$4 sm:$0xff]  }
 0x127   :  { %2646 = vmatpush1.bf16.msra.mxu0 %v3759_v6  ;;  %2534 = vmatprep.subr.bf16.mxu1 %v3770_v9  ;;  %v3833_v6 = vld [vmem:[#allocation5 + $0x398] ss:$28 sps:$4 sm:$0xff]   ;;  %v3834_v9 = vld [vmem:[#allocation5 + $0x7f0] ss:$28 sps:$4 sm:$0xff]  }
 0x128   :  { %2647 = vmatprep.subr.bf16.mxu0 %v3767_v8  ;;  %v3837_v8 = vld [vmem:[#allocation5 + $0x590] ss:$28 sps:$4 sm:$0xff]  }
 0x12a   :  { %2535 = vmatpush1.bf16.msra.mxu1 %v3768_v13  ;;  %v3841_v13 = vld [vmem:[#allocation5 + $0x82c] ss:$28 sps:$4 sm:$0xff]  }
 0x12b   :  { %2648 = vmatpush1.bf16.msra.mxu0 %v3765_v12  ;;  %2536 = vmatprep.subr.bf16.mxu1 %v3776_v15  ;;  %v3838_v12 = vld [vmem:[#allocation5 + $0x3d0] ss:$28 sps:$4 sm:$0xff]   ;;  %v3839_v15 = vld [vmem:[#allocation5 + $0x828] ss:$28 sps:$4 sm:$0xff]  }
 0x12c   :  { %2649 = vmatprep.subr.bf16.mxu0 %v3773_v14  ;;  %v3842_v14 = vld [vmem:[#allocation5 + $0x5c8] ss:$28 sps:$4 sm:$0xff]  }
 0x12e   :  { %2537 = vmatpush1.bf16.msra.mxu1 %v3774_v18  ;;  %v3846_v18 = vld [vmem:[#allocation5 + $0x864] ss:$28 sps:$4 sm:$0xff]  }
 0x12f   :  { %2650 = vmatpush1.bf16.msra.mxu0 %v3771_v16  ;;  %2538 = vmatprep.subr.bf16.mxu1 %v3782_v20  ;;  %v3843_v16 = vld [vmem:[#allocation5 + $0x408] ss:$28 sps:$4 sm:$0xff]   ;;  %v3848_v20 = vld [vmem:[#allocation5 + $0x440] ss:$28 sps:$4 sm:$0xff]  }
 0x130   :  { %2651 = vmatprep.subr.bf16.mxu0 %v3779_v19  ;;  %v3847_v19 = vld [vmem:[#allocation5 + $0x600] ss:$28 sps:$4 sm:$0xff]  }
 0x132   :  { %2539 = vmatpush1.bf16.msra.mxu1 %v3780_v22  ;;  %v3852_v22 = vld [vmem:[#allocation5 + $0x638] ss:$28 sps:$4 sm:$0xff]  }
 0x133   :  { %2652 = vmatpush1.bf16.msra.mxu0 %v3777_v21  ;;  %2540 = vmatprep.subr.bf16.mxu1 %v3788_v25  ;;  %v3851_v21 = vld [vmem:[#allocation5 + $0x89c] ss:$28 sps:$4 sm:$0xff]   ;;  %v3856_v25 = vld [vmem:[#allocation5 + $0x8d4] ss:$28 sps:$4 sm:$0xff]  }
 0x134   :  { %2653 = vmatprep.subr.bf16.mxu0 %v3785_v23  ;;  %v3849_v23 = vld [vmem:[#allocation5 + $0x898] ss:$28 sps:$4 sm:$0xff]  }
 0x136   :  { %2541 = vmatpush1.bf16.msra.mxu1 %v3786_v27  ;;  %v3854_v27 = vld [vmem:[#allocation5 + $0x8d0] ss:$28 sps:$4 sm:$0xff]  }
 0x137   :  { %2654 = vmatpush1.bf16.msra.mxu0 %v3783_v26  ;;  %3293 = vmatprep.subr.bf16.mxu1 %v3792_v30  ;;  %v3857_v26 = vld [vmem:[#allocation5 + $0x670] ss:$28 sps:$4 sm:$0xff]  }
 0x138   :  { %2655 = vmatprep.subr.bf16.mxu0 %v3791_v29  ;;  %v3858_v29 = vld [vmem:[#allocation5 + $0x4b0] ss:$28 sps:$4 sm:$0xff]  }
 0x139   :  { %2543 = vmatmul.mubr.bf16.vlgmr.msra.gmra.mrb[4].mxu1 %v4079_v17  ;;  %v3861_v30 = vld [vmem:[#allocation5 + $0x90c] ss:$28 sps:$4 sm:$0xff]  }
 0x13a   :  { %3294 = vmatpush3.bf16.msra.mxu1 %v3793_v32  ;;  %2788 = vmatprep.mubr.bf16.mxu1 %v4063_v47  ;;  %v3813_v47 = vld [vmem:[#allocation5 + $0xf8] ss:$28 sps:$4 sm:$0xff]   ;;  %v3859_v32 = vld [vmem:[#allocation5 + $0x908] ss:$28 sps:$4 sm:$0xff]  }
 0x13b   :  { %2656 = vmatpush1.bf16.msra.mxu0 %v3789_v31  ;;  %3295 = vmatprep.subr.bf16.mxu1 %v3797_v34  ;;  %v3862_v31 = vld [vmem:[#allocation5 + $0x6a8] ss:$28 sps:$4 sm:$0xff]  }
 0x13c   :  { %2657 = vmatprep.subr.bf16.mxu0 %v3796_v33  ;;  %v3863_v33 = vld [vmem:[#allocation5 + $0x4e8] ss:$28 sps:$4 sm:$0xff]  }
 0x13d   :  { %v3866_v34 = vld [vmem:[#allocation5 + $0x944] ss:$28 sps:$4 sm:$0xff]  }
 0x13e   :  { %3296 = vmatpush3.bf16.msra.mxu1 %v3798_v37  ;;  %v3864_v37 = vld [vmem:[#allocation5 + $0x940] ss:$28 sps:$4 sm:$0xff]  }
 0x13f   :  { %2658 = vmatpush1.bf16.msra.mxu0 %v3794_v36  ;;  %3297 = vmatprep.subr.bf16.mxu1 %v3802_v39  ;;  %v3867_v36 = vld [vmem:[#allocation5 + $0x6e0] ss:$28 sps:$4 sm:$0xff]  }
 0x140   :  { %2659 = vmatprep.subr.bf16.mxu0 %v3801_v38  ;;  %v3868_v38 = vld [vmem:[#allocation5 + $0x520] ss:$28 sps:$4 sm:$0xff]  }
 0x141   :  { %v3871_v39 = vld [vmem:[#allocation5 + $0x97c] ss:$28 sps:$4 sm:$0xff]  }
 0x142   :  { %3298 = vmatpush3.bf16.msra.mxu1 %v3803_v41  ;;  %v3869_v41 = vld [vmem:[#allocation5 + $0x978] ss:$28 sps:$4 sm:$0xff]  }
 0x143   :  { %2660 = vmatpush1.bf16.msra.mxu0 %v3799_v40  ;;  %3299 = vmatprep.subr.bf16.mxu1 %v3807_v43  ;;  %v3872_v40 = vld [vmem:[#allocation5 + $0x8d8] ss:$28 sps:$4 sm:$0xff]  }
 0x144   :  { %2661 = vmatprep.subr.bf16.mxu0 %v3806_v42  ;;  %v3873_v42 = vld [vmem:[#allocation5 + $0x718] ss:$28 sps:$4 sm:$0xff]  }
 0x145   :  { %v3876_v43 = vld [vmem:[#allocation5 + $0x9b4] ss:$28 sps:$4 sm:$0xff]  }
 0x146   :  { %3300 = vmatpush3.bf16.msra.mxu1 %v3808_v45  ;;  %v3874_v45 = vld [vmem:[#allocation5 + $0x9b0] ss:$28 sps:$4 sm:$0xff]  }
 0x147   :  { %2662 = vmatpush1.bf16.msra.mxu0 %v3804_v44  ;;  %3301 = vmatprep.subr.bf16.mxu1 %v3812_v48  ;;  %v3877_v44 = vld [vmem:[#allocation5 + $0x910] ss:$28 sps:$4 sm:$0xff]  }
 0x148   :  { %2663 = vmatprep.subr.bf16.mxu0 %v3811_v46  ;;  %v3878_v46 = vld [vmem:[#allocation5 + $0x750] ss:$28 sps:$4 sm:$0xff]  }
 0x149   :  { %v3881_v48 = vld [vmem:[#allocation5 + $0x9ec] ss:$28 sps:$4 sm:$0xff]  }
 0x14a   :  { %3302 = vmatpush3.bf16.msra.mxu1 %v3813_v47  ;;  %v3879_v47 = vld [vmem:[#allocation5 + $0x9e8] ss:$28 sps:$4 sm:$0xff]  }
 0x14b   :  { %2664 = vmatpush1.bf16.msra.mxu0 %v3809_v49  ;;  %3303 = vmatprep.subr.bf16.mxu1 %v3817_v52  ;;  %v3882_v49 = vld [vmem:[#allocation5 + $0x948] ss:$28 sps:$4 sm:$0xff]  }
 0x14c   :  { %2674 = vmatprep.subr.bf16.mxu0 %v3816_v50  ;;  %v4099_v57 = vpop.f32.mrb[0].mxu1  ;;  %v3883_v50 = vld [vmem:[#allocation5 + $0x788] ss:$28 sps:$4 sm:$0xff]  }
 0x14d   :  { %v4102_v58 = vpop.f32.mrb[1].mxu1  ;;  %v3886_v52 = vld [vmem:[#allocation5 + $0xa24] ss:$28 sps:$4 sm:$0xff]  }
 0x14e   :  { %2666 = vmatmul.mubr.bf16.vlgmr.msra.gmra.mrb[8].mxu0 %v4071_v11  ;;  %3304 = vmatpush3.bf16.msra.mxu1 %v3818_v54  ;;  %v2302_v59 = vpop.f32.mrb[2].mxu1  ;;  %v3888_v54 = vld [vmem:[#allocation5 + $0x7c0] ss:$28 sps:$4 sm:$0xff]  }
 0x14f   :  { %2675 = vmatpush1.bf16.msra.mxu0 %v3814_v53  ;;  %v2303_v62 = vpop.f32.mrb[3].mxu1  ;;  %3305 = vmatprep.subr.bf16.mxu1 %v3822_v56  ;;  %v3887_v53 = vld [vmem:[#allocation5 + $0x980] ss:$28 sps:$4 sm:$0xff]   ;;  %v3892_v56 = vld [vmem:[#allocation5 + $0x9b8] ss:$28 sps:$4 sm:$0xff]  }
 0x150   :  { %2676 = vmatprep.subr.bf16.mxu0 %v3821_v55  ;;  %2706 = vmatprep.mubr.bf16.mxu0 %v4076_v35  ;;  %v3891_v55 = vld [vmem:[#allocation5 + $0xa5c] ss:$28 sps:$4 sm:$0xff]   ;;  %v3897_v62 = vld [vmem:[#allocation5 + $0x9f0] ss:$28 sps:$4 sm:$0xff]  }
 0x151   :  { %v3889_v59 = vld [vmem:[#allocation5 + $0xa58] ss:$28 sps:$4 sm:$0xff]  }
 0x152   :  { %3306 = vmatpush3.bf16.msra.mxu1 %v3823_v61  ;;  %v3896_v61 = vld [vmem:[#allocation5 + $0xa94] ss:$28 sps:$4 sm:$0xff]  }
 0x153   :  { %2677 = vmatpush1.bf16.msra.mxu0 %v3819_v60  ;;  %3307 = vmatprep.subr.bf16.mxu1 %v3827_v0  ;;  %v461_v60 = vlaneseq  ;;  %v3898_v0 = vld [vmem:[#allocation5 + $0x830] ss:$28 sps:$4 sm:$0xff]  }
 0x154   :  { %2678 = vmatprep.subr.bf16.mxu0 %v3826_v63  ;;  %v3894_v63 = vld [vmem:[#allocation5 + $0xa90] ss:$28 sps:$4 sm:$0xff]  }
 0x156   :  { %3308 = vmatpush3.bf16.msra.mxu1 %v3828_v2  ;;  %v3899_v2 = vld [vmem:[#allocation5 + $0xa28] ss:$28 sps:$4 sm:$0xff]  }
 0x157   :  { %2679 = vmatpush1.bf16.msra.mxu0 %v3824_v1  ;;  %3315 = vmatprep.subr.bf16.mxu1 %v3832_v4  ;;  %v4109_v1 = vshrl.u32 %v461_v60, 7 }
 0x158   :  { %2680 = vmatprep.subr.bf16.mxu0 %v3831_v3  ;;  %v3900_v3 = vld [vmem:[#allocation5 + $0x868] ss:$28 sps:$4 sm:$0xff]  }
 0x159   :  { %2789 = vmatmul.mubr.bf16.vlgmr.msra.gmra.mrb[8].mxu1 %v4069_v10  ;;  %v3844_v10 = vld [vmem:[#allocation5 + $0x860] ss:$28 sps:$4 sm:$0xff]   ;;  %v463_v4 = vsub.s32 0, %v4109_v1 }
 0x15a   :  { %3316 = vmatpush3.bf16.msra.mxu1 %v3833_v6  ;;  %2828 = vmatprep.mubr.bf16.mxu1 %v4065_v51  ;;  %v3853_v51 = vld [vmem:[#allocation5 + $0x478] ss:$28 sps:$4 sm:$0xff]  }
 0x15b   :  { %2681 = vmatpush1.bf16.msra.mxu0 %v3829_v5  ;;  %3317 = vmatprep.subr.bf16.mxu1 %v3837_v8  ;;  %v3901_v5 = vld [vmem:[#allocation5 + $0xa60] ss:$28 sps:$4 sm:$0xff]   ;;  %v4004_v8 = vmov 0.0  }
 0x15c   :  { %2682 = vmatprep.subr.bf16.mxu0 %v3836_v7  ;;  %v4114_v6 = vld [vmem:[#allocation7] sm:$0x7f]  ;;  %v467_v7 = vsub.s32 1, %v4109_v1 }
 0x15e   :  { %3318 = vmatpush3.bf16.msra.mxu1 %v3838_v12  ;;  %v464_v12 = vrot.slane %v4114_v6, %v463_v4 }
 0x15f   :  { %2683 = vmatpush1.bf16.msra.mxu0 %v3834_v9  ;;  %3319 = vmatprep.subr.bf16.mxu1 %v3842_v14  ;;  %v3902_v9 = vld [vmem:[#allocation5 + $0x8a0] ss:$28 sps:$4 sm:$0xff]   ;;  %v3903_v14 = vld [vmem:[#allocation5 + $0xa98] ss:$28 sps:$4 sm:$0xff]  }
 0x160   :  { %2684 = vmatprep.subr.bf16.mxu0 %v3841_v13  ;;  %v468_v13 = vrot.slane %v4114_v6, %v467_v7 }
 0x162   :  { %3320 = vmatpush3.bf16.msra.mxu1 %v3843_v16  ;;  %v2301_v16 = vadd.f32 %v4102_v58, %v468_v13 }
 0x163   :  { %2685 = vmatpush1.bf16.msra.mxu0 %v3839_v15  ;;  %3321 = vmatprep.subr.bf16.mxu1 %v3847_v19  ;;  %v2299_v15 = vadd.f32 %v4099_v57, %v464_v12 }
 0x164   :  { %2686 = vmatprep.subr.bf16.mxu0 %v3846_v18 }
 0x166   :  { %3322 = vmatpush3.bf16.msra.mxu1 %v3848_v20 }
 0x167   :  { %2687 = vmatpush1.bf16.msra.mxu0 %v3844_v10  ;;  %3323 = vmatprep.subr.bf16.mxu1 %v3852_v22 }
 0x168   :  { %2688 = vmatprep.subr.bf16.mxu0 %v3851_v21 }
 0x16a   :  { %3324 = vmatpush3.bf16.msra.mxu1 %v3853_v51 }
 0x16b   :  { %2689 = vmatpush1.bf16.msra.mxu0 %v3849_v23  ;;  %3325 = vmatprep.subr.bf16.mxu1 %v3857_v26  ;;  %v471_v26 = vsub.s32 2, %v4109_v1 }
 0x16c   :  { %2690 = vmatprep.subr.bf16.mxu0 %v3856_v25 }
 0x16e   :  { %3326 = vmatpush3.bf16.msra.mxu1 %v3858_v29 }
 0x16f   :  { %2691 = vmatpush1.bf16.msra.mxu0 %v3854_v27  ;;  %3327 = vmatprep.subr.bf16.mxu1 %v3862_v31  ;;  %v472_v27 = vrot.slane %v4114_v6, %v471_v26 }
 0x170   :  { %2692 = vmatprep.subr.bf16.mxu0 %v3861_v30 }
 0x172   :  { %3328 = vmatpush3.bf16.msra.mxu1 %v3863_v33 }
 0x173   :  { %2693 = vmatpush1.bf16.msra.mxu0 %v3859_v32  ;;  %3329 = vmatprep.subr.bf16.mxu1 %v3867_v36 }
 0x174   :  { %2694 = vmatprep.subr.bf16.mxu0 %v3866_v34 }
 0x176   :  { %3330 = vmatpush3.bf16.msra.mxu1 %v3868_v38 }
 0x177   :  { %2695 = vmatpush1.bf16.msra.mxu0 %v3864_v37  ;;  %3337 = vmatprep.subr.bf16.mxu1 %v3872_v40 }
 0x178   :  { %2696 = vmatprep.subr.bf16.mxu0 %v3871_v39 }
 0x179   :  { %2829 = vmatmul.mubr.bf16.vlgmr.msra.gmra.mrb[12].mxu1 %v4071_v11  ;;  %v3884_v11 = vld [vmem:[#allocation5 + $0xa20] ss:$28 sps:$4 sm:$0xff]  }
 0x17a   :  { %3338 = vmatpush3.bf16.msra.mxu1 %v3873_v42  ;;  %2868 = vmatprep.mubr.bf16.mxu1 %v4076_v35  ;;  %v3893_v35 = vld [vmem:[#allocation5 + $0x7f8] ss:$28 sps:$4 sm:$0xff]  }
 0x17b   :  { %2697 = vmatpush1.bf16.msra.mxu0 %v3869_v41  ;;  %3339 = vmatprep.subr.bf16.mxu1 %v3877_v44 }
 0x17c   :  { %2698 = vmatprep.subr.bf16.mxu0 %v3876_v43 }
 0x17e   :  { %3340 = vmatpush3.bf16.msra.mxu1 %v3878_v46 }
 0x17f   :  { %2699 = vmatpush1.bf16.msra.mxu0 %v3874_v45  ;;  %3341 = vmatprep.subr.bf16.mxu1 %v3882_v49  ;;  %v487_v45 = vsub.s32 6, %v4109_v1 }
 0x180   :  { %2700 = vmatprep.subr.bf16.mxu0 %v3881_v48 }
 0x181   :  { %v488_v46 = vrot.slane %v4114_v6, %v487_v45 }
 0x182   :  { %3342 = vmatpush3.bf16.msra.mxu1 %v3883_v50 }
 0x183   :  { %2701 = vmatpush1.bf16.msra.mxu0 %v3879_v47  ;;  %3343 = vmatprep.subr.bf16.mxu1 %v3887_v53 }
 0x184   :  { %2702 = vmatprep.subr.bf16.mxu0 %v3886_v52 }
 0x186   :  { %3344 = vmatpush3.bf16.msra.mxu1 %v3888_v54  ;;  %v479_v54 = vsub.s32 4, %v4109_v1 }
 0x187   :  { %2703 = vmatpush1.bf16.msra.mxu0 %v3884_v11  ;;  %3345 = vmatprep.subr.bf16.mxu1 %v3892_v56 }
 0x188   :  { %2704 = vmatprep.subr.bf16.mxu0 %v3891_v55  ;;  %v483_v55 = vsub.s32 5, %v4109_v1  ;;  %v480_v56 = vrot.slane %v4114_v6, %v479_v54 }
 0x18a   :  { %3346 = vmatpush3.bf16.msra.mxu1 %v3893_v35 }
 0x18b   :  { %2705 = vmatpush1.bf16.msra.mxu0 %v3889_v59  ;;  %3347 = vmatprep.subr.bf16.mxu1 %v3897_v62  ;;  %v484_v59 = vrot.slane %v4114_v6, %v483_v55 }
 0x18c   :  { %2715 = vmatprep.subr.bf16.mxu0 %v3896_v61 }
 0x18e   :  { %2707 = vmatmul.mubr.bf16.vlgmr.msra.gmra.mrb[8].mxu0 %v4079_v17  ;;  %3348 = vmatpush3.bf16.msra.mxu1 %v3898_v0 }
 0x18f   :  { %2716 = vmatpush1.bf16.msra.mxu0 %v3894_v63  ;;  %3349 = vmatprep.subr.bf16.mxu1 %v3899_v2 }
 0x190   :  { %2747 = vmatprep.mubr.bf16.mxu0 %v4003_v24  ;;  %3361 = vmatprep.subr.bf16.mxu0 %v4004_v8 }
 0x192   :  { %3350 = vmatpush3.bf16.msra.mxu1 %v3900_v3 }
 0x193   :  { %3351 = vmatprep.subr.bf16.mxu1 %v3901_v5 }
 0x196   :  { %3352 = vmatpush3.bf16.msra.mxu1 %v3902_v9 }
 0x199   :  { %v2421_v24 = vpop.f32.mrb[0].mxu0  ;;  %2869 = vmatmul.mubr.bf16.vlgmr.msra.gmra.mrb[16].mxu1 %v4079_v17  ;;  %v475_v17 = vsub.s32 3, %v4109_v1 }
 0x19a   :  { %v3368_v18 = vadd.f32 %v2421_v24, %v2299_v15  ;;  %3291 = vmatmul.mubr.msk.bf16.vlgmr.msra.gmra.mrb[8].mxu0 %vm2260_vm0, %v4085_v28  ;;  %v2423_v19 = vpop.f32.mrb[1].mxu0 }
 0x19b   :  { %v3370_v10 = vadd.f32 %v2423_v19, %v2301_v16  ;;  %3362 = vmatpush3.bf16.msra.mxu0 %v3903_v14  ;;  %v2425_v20 = vpop.f32.mrb[2].mxu0  ;;  %3363 = vmatprep.mubr.msk.bf16.mxu0 %vm4005_vm1, %v4004_v8  ;;  %v476_v29 = vrot.slane %v4114_v6, %v475_v17 }
 0x19c   :  { %v2916_v21 = vmax.f32 %v3368_v18, 0.0  ;;  %v2426_v22 = vpop.f32.mrb[3].mxu0 }
 0x19d   :  { %v2917_v23 = vmax.f32 %v3370_v10, 0.0 }
 0x19e   :  { %2923 = vst [vmem:[#allocation8] sm:$0xff] %v2916_v21 }
 0x19f   :  { %2924 = vst [vmem:[#allocation8 + $0x8] sm:$0xff] %v2917_v23 }
 0x1a1   :  { %v2585_v57 = vpop.f32.mrb[4].mxu0 }
 0x1a2   :  { %3364 = vmatmul.mubr.msk.bf16.vlgmr.msra.gmra.mrb[12].mxu0 %vm2260_vm0, %v4085_v28  ;;  %v2587_v58 = vpop.f32.mrb[5].mxu0 }
 0x1a3   :  { %v2589_v51 = vpop.f32.mrb[6].mxu0 }
 0x1a4   :  { %v2590_v25 = vpop.f32.mrb[7].mxu0 }
 0x20c   :  { %v2544_v30 = vpop.f32.mrb[4].mxu1 }
 0x20d   :  { %v3371_v31 = vadd.f32 %v2544_v30, %v472_v27  ;;  %v2546_v32 = vpop.f32.mrb[5].mxu1 }
 0x20e   :  { %v3373_v33 = vadd.f32 %v2546_v32, %v476_v29  ;;  %v2548_v34 = vpop.f32.mrb[6].mxu1 }
 0x20f   :  { %v3372_v36 = vadd.f32 %v3371_v31, %v2585_v57  ;;  %v2549_v37 = vpop.f32.mrb[7].mxu1 }
 0x210   :  { %v3374_v38 = vadd.f32 %v3373_v33, %v2587_v58 }
 0x211   :  { %v2918_v28 = vmax.f32 %v3372_v36, 0.0 }
 0x212   :  { %v2919_v39 = vmax.f32 %v3374_v38, 0.0 }
 0x213   :  { %2925 = vst [vmem:[#allocation8 + $0x10] sm:$0xff] %v2918_v28 }
 0x214   :  { %2926 = vst [vmem:[#allocation8 + $0x18] sm:$0xff] %v2919_v39 }
 0x22c   :  { %v3309_v40 = vpop.f32.mrb[8].mxu1 }
 0x22d   :  { %v3310_v41 = vpop.f32.mrb[9].mxu1 }
 0x22e   :  { %v3311_v42 = vadd.f32 %v3310_v41, %v3309_v40  ;;  %v3312_v43 = vpop.f32.mrb[10].mxu1 }
 0x22f   :  { %v3313_v44 = vpop.f32.mrb[11].mxu1 }
 0x230   :  { %v2791_v47 = vadd.f32 %v3311_v42, %v488_v46 }
 0x24c   :  { %v3331_v48 = vpop.f32.mrb[12].mxu1 }
 0x24d   :  { %v3332_v49 = vpop.f32.mrb[13].mxu1 }
 0x24e   :  { %v3333_v50 = vadd.f32 %v3332_v49, %v3331_v48  ;;  %v3334_v52 = vpop.f32.mrb[14].mxu1 }
 0x24f   :  { %v3335_v53 = vpop.f32.mrb[15].mxu1 }
 0x250   :  { %v2831_v11 = vadd.f32 %v3333_v50, %v2791_v47 }
 0x26c   :  { %v3353_v60 = vpop.f32.mrb[16].mxu1 }
 0x26d   :  { %v2749_v35 = vpop.f32.mrb[8].mxu0  ;;  %v3354_v63 = vpop.f32.mrb[17].mxu1 }
 0x26e   :  { %v3375_v61 = vadd.f32 %v2749_v35, %v480_v56  ;;  %v2751_v62 = vpop.f32.mrb[9].mxu0  ;;  %v3355_v3 = vadd.f32 %v3354_v63, %v3353_v60  ;;  %v3356_v4 = vpop.f32.mrb[18].mxu1 }
 0x26f   :  { %v3376_v0 = vadd.f32 %v2751_v62, %v484_v59  ;;  %v2753_v2 = vpop.f32.mrb[10].mxu0  ;;  %v3357_v8 = vpop.f32.mrb[19].mxu1 }
 0x270   :  { %v2920_v5 = vmax.f32 %v3375_v61, 0.0  ;;  %v2754_v7 = vpop.f32.mrb[11].mxu0  ;;  %v2871_v12 = vadd.f32 %v3355_v3, %v2831_v11 }
 0x271   :  { %v2921_v9 = vmax.f32 %v3376_v0, 0.0 }
 0x272   :  { %2927 = vst [vmem:[#allocation8 + $0x20] sm:$0xff] %v2920_v5 }
 0x273   :  { %2928 = vst [vmem:[#allocation8 + $0x28] sm:$0xff] %v2921_v9 }
 0x275   :  { %v2910_v1 = vpop.f32.mrb[12].mxu0 }
 0x276   :  { %v2911_v6 = vadd.f32 %v2910_v1, %v2871_v12  ;;  %v3365_v13 = vpop.f32.mrb[13].mxu0 }
 0x277   :  { %v2913_v14 = vpop.f32.mrb[14].mxu0 }
 0x278   :  { %v2922_v15 = vmax.f32 %v2911_v6, 0.0  ;;  %v3366_v16 = vpop.f32.mrb[15].mxu0 }
 0x27a   :  { %2929 = vst.msk [vmem:[#allocation8 + $0x30] sm:$0xff] %vm2260_vm0, %v2922_v15 }
 0x27b   :  { %3981 = shalt.err (!%p3978_p0)
}
 0x27c   :  { %s3982_s26 = scalar_lea.hbm %s4152_s3, 896 }
 0x27d   :  { %p3983_p1 = scmp.ne.s32.totalorder %s4152_s3, %s3982_s26  ;;  %p3986_p2 = scmp.lt.u32.totalorder %s3982_s26, %s4152_s3 }
 0x27f   :  { %p3988_p3 = pnand %p3986_p2, %p3983_p1 }
 0x281   :  { %3991 = shalt.err (!%p3988_p3)
}
 0x282   :  { %2939 = dma.vmem_to_hbm [thread:$0]  %s2937_s22, 896, %s4152_s3, [#allocation4]  }
 0x283   :  { %3996 = dma.done.wait [#allocation4], 896  }
 0x284   :  { %3997 = vsyncadd [#allocation4], 4294966400 }
 0x285   :  { %2943 = vsyncpa [#allocation3], 1 }
 0x286   :  { %2944 = vsyncpa [#allocation6], 1 }
 0x287   :  { %2945 = vsyncpa [#allocation4], 1 }

</bundles_post_ra>
